<compile_context>
chip_gen: v6e
topology: v6e:2x2x1
jax: 0.10.0
libtpu: 0.0.40
codegen_flags: <defaults>
</compile_context>

<pallas_src>
import functools

import jax
import jax.numpy as jnp
from jax.experimental import pallas as pl
from jax.experimental.pallas import tpu as pltpu


# --------------------------------------------------------------------------
# Fused forward kernel (single grid point; everything VMEM-resident)
# --------------------------------------------------------------------------
def _fagcn_fused_kernel(*refs, num_layers, num_view):
    a_ref, b_ref, c_ref, adjs_hat_ref, adjs_wave_ref, x_ref = refs[:6]
    w_refs = refs[6:6 + num_layers]
    out_ref = refs[6 + num_layers]                 # packed (3, n, d_last)
    adj_scr, act_scr = refs[7 + num_layers:]       # VMEM scratch (bf16)

    n = x_ref.shape[0]

    # ---- view-weighted adjacency sums: f32 accumulate, pinned once as bf16 ----
    # Sequential (hat, then wave) so only one (n, n) f32 accumulator is live.
    adj_hat = jnp.zeros((n, n), jnp.float32)
    for v in range(num_view):                      # tiny static loop over views
        adj_hat = adj_hat + a_ref[v] * adjs_hat_ref[v, :, :].astype(jnp.float32)
    adj_scr[:n, :] = adj_hat.astype(jnp.bfloat16)

    adj_wave = jnp.zeros((n, n), jnp.float32)
    for v in range(num_view):
        adj_wave = adj_wave + b_ref[v] * adjs_wave_ref[v, :, :].astype(jnp.float32)
    adj_scr[n:, :] = adj_wave.astype(jnp.bfloat16)

    # ---- layer 0: emb1 == emb2 == x, so x @ W0 is shared and the adjacency
    #      propagation is ONE stacked (2n, n) @ (n, d0) MXU dot (M = 2n). ----
    d0 = w_refs[0].shape[1]
    xw_bf = jnp.dot(x_ref[...].astype(jnp.bfloat16),
                    w_refs[0][...].astype(jnp.bfloat16),
                    preferred_element_type=jnp.float32).astype(jnp.bfloat16)
    prop = jnp.dot(adj_scr[...], xw_bf, preferred_element_type=jnp.float32)  # (2n, d0)

    if num_layers == 1:
        e1 = prop[:n, :]
        e2 = prop[n:, :]
    else:
        act_scr[:, :d0] = jnp.maximum(prop, 0.0).astype(jnp.bfloat16)
        e1 = e2 = None

    # ---- deeper layers: feature transform batched over both branches straight
    #      from the pinned activation scratch; adjacency propagation per branch.
    for li in range(1, num_layers):
        d_in, d_out = w_refs[li].shape
        w_bf = w_refs[li][...].astype(jnp.bfloat16)
        sw_bf = jnp.dot(act_scr[:, :d_in], w_bf,
                        preferred_element_type=jnp.float32).astype(jnp.bfloat16)
        e1 = jnp.dot(adj_scr[:n, :], sw_bf[:n, :], preferred_element_type=jnp.float32)
        e2 = jnp.dot(adj_scr[n:, :], sw_bf[n:, :], preferred_element_type=jnp.float32)
        if li < num_layers - 1:
            act_scr[:n, :d_out] = jnp.maximum(e1, 0.0).astype(jnp.bfloat16)
            act_scr[n:, :d_out] = jnp.maximum(e2, 0.0).astype(jnp.bfloat16)

    # ---- fused final combine; single packed output slab (one write-back DMA) ----
    out_ref[0] = (c_ref[0] * e1 + c_ref[1] * e2).astype(out_ref.dtype)
    out_ref[1] = e1.astype(out_ref.dtype)
    out_ref[2] = e2.astype(out_ref.dtype)


# --------------------------------------------------------------------------
# Wrapper: one pallas_call for the whole forward pass
# --------------------------------------------------------------------------
def fagcn_forward(params, x, adj_hat_list, adj_wave_list):
    a = jax.nn.softmax(params["a"])        # tiny vectors: glue in plain JAX
    b = jax.nn.softmax(params["b"])
    c = jax.nn.softmax(params["c"])

    # bf16 view stacks: halves the dominant HBM->VMEM DMA and VMEM residency.
    adjs_hat = jnp.stack(adj_hat_list, axis=0).astype(jnp.bfloat16)    # [V, n, n]
    adjs_wave = jnp.stack(adj_wave_list, axis=0).astype(jnp.bfloat16)  # [V, n, n]

    gc_weights = list(params["gc"])
    num_layers = len(gc_weights)
    num_view, n, _ = adjs_hat.shape
    d_in = x.shape[1]
    d_last = gc_weights[-1].shape[1]
    # Widest activation the (2n, d) scratch must hold (inputs to layers >= 1).
    d_act = max([w.shape[0] for w in gc_weights[1:]], default=8)

    kernel = functools.partial(
        _fagcn_fused_kernel, num_layers=num_layers, num_view=num_view)

    in_specs = [
        pl.BlockSpec(memory_space=pltpu.SMEM),               # a  (scalars)
        pl.BlockSpec(memory_space=pltpu.SMEM),               # b  (scalars)
        pl.BlockSpec(memory_space=pltpu.SMEM),               # c  (scalars)
        pl.BlockSpec((num_view, n, n), lambda: (0, 0, 0)),   # adj_hat views (bf16)
        pl.BlockSpec((num_view, n, n), lambda: (0, 0, 0)),   # adj_wave views (bf16)
        pl.BlockSpec((n, d_in), lambda: (0, 0)),             # x
    ] + [pl.BlockSpec(w.shape, lambda: (0, 0)) for w in gc_weights]

    out_shape = jax.ShapeDtypeStruct((3, n, d_last), jnp.float32)   # [out; emb1; emb2]
    out_spec = pl.BlockSpec((3, n, d_last), lambda: (0, 0, 0))

    scratch_shapes = [
        pltpu.VMEM((2 * n, n), jnp.bfloat16),        # mixed adjacencies [hat; wave]
        pltpu.VMEM((2 * n, d_act), jnp.bfloat16),    # batched branch activations
    ]

    # Explicit VMEM budget from the actual buffer footprint (default scoped
    # limit is only 16/32 MiB and would bite well before physical VMEM as n grows).
    bytes_views = 2 * num_view * n * n * 2                 # bf16 view stacks
    bytes_x = n * d_in * 4
    bytes_w = sum(int(w.size) * 4 for w in gc_weights)
    bytes_out = 3 * n * d_last * 4
    bytes_scr = (2 * n) * n * 2 + (2 * n) * d_act * 2
    vmem_need = bytes_views + bytes_x + bytes_w + bytes_out + bytes_scr
    vmem_limit = min(int(1.5 * vmem_need) + (8 << 20), 100 << 20)

    # Advisory cost estimate for XLA's scheduler.
    flops = 2 * (2 * num_view) * n * n                     # two weighted adj sums
    d0_in, d0_out = gc_weights[0].shape
    flops += 2 * n * d0_in * d0_out                        # shared x @ W0
    flops += 2 * (2 * n) * n * d0_out                      # stacked layer-0 adj dot
    for w in gc_weights[1:]:
        din, dout = w.shape
        flops += 2 * (2 * n) * din * dout                  # batched feature transform
        flops += 2 * (2 * n * n * dout)                    # two adjacency dots
    bytes_accessed = bytes_views + bytes_x + bytes_w + bytes_out

    packed = pl.pallas_call(
        kernel,
        out_shape=out_shape,
        in_specs=in_specs,
        out_specs=out_spec,
        scratch_shapes=scratch_shapes,
        compiler_params=pltpu.CompilerParams(vmem_limit_bytes=vmem_limit),
        cost_estimate=pl.CostEstimate(
            flops=int(flops), transcendentals=0,
            bytes_accessed=int(bytes_accessed)),
    )(a, b, c, adjs_hat, adjs_wave, x, *gc_weights)

    out, emb1, emb2 = packed[0], packed[1], packed[2]
    return out, emb1, emb2, c[0], c[1]


# --------------------------------------------------------------------------
# Pure-JAX f32 reference (mirrors FAGCN.forward) for validation
# --------------------------------------------------------------------------
def fagcn_reference(params, x, adj_hat_list, adj_wave_list):
    a = jax.nn.softmax(params["a"])
    b = jax.nn.softmax(params["b"])
    c = jax.nn.softmax(params["c"])
    adj_hat = sum(w * e for e, w in zip(adj_hat_list, a))
    adj_wave = sum(w * e for e, w in zip(adj_wave_list, b))
    emb1, emb2 = x, x
    for w in params["gc"][:-1]:
        emb1 = jax.nn.relu(adj_hat @ (emb1 @ w))
        emb2 = jax.nn.relu(adj_wave @ (emb2 @ w))
    emb1 = adj_hat @ (emb1 @ params["gc"][-1])
    emb2 = adj_wave @ (emb2 @ params["gc"][-1])
    return c[0] * emb1 + c[1] * emb2, emb1, emb2


# --------------------------------------------------------------------------
# Parameter init (deterministic; mirrors torch module's __init__ shapes)
# --------------------------------------------------------------------------
def glorot_init(key, input_dim, output_dim):
    init_range = jnp.sqrt(6.0 / (input_dim + output_dim))
    u = jax.random.uniform(key, (input_dim, output_dim), dtype=jnp.float32)
    return u * 2.0 * init_range - init_range


def init_fagcn_params(key, hidden_dims, num_view):
    keys = jax.random.split(key, len(hidden_dims) - 1)
    gc_weights = [
        glorot_init(keys[i], hidden_dims[i], hidden_dims[i + 1])
        for i in range(len(hidden_dims) - 1)
    ]
    a = jnp.ones((num_view,), jnp.float32)
    b = jnp.ones((num_view,), jnp.float32)
    c = jnp.array([7.0, 5.0], jnp.float32)
    return {"gc": gc_weights, "a": a, "b": b, "c": c}


if __name__ == "__main__":
    key = jax.random.PRNGKey(0)
    n = 128                      # number of graph nodes
    hidden_dims = [32, 64, 16]   # input dim 32, hidden 64, output 16
    num_view = 2

    k_params, k_x, k_h0, k_h1, k_w0, k_w1 = jax.random.split(key, 6)
    params = init_fagcn_params(k_params, hidden_dims, num_view)

    x = jax.random.normal(k_x, (n, hidden_dims[0]), dtype=jnp.float32)
    adj_hat_list = [
        jax.random.uniform(k_h0, (n, n), dtype=jnp.float32),
        jax.random.uniform(k_h1, (n, n), dtype=jnp.float32),
    ]
    adj_wave_list = [
        jax.random.uniform(k_w0, (n, n), dtype=jnp.float32),
        jax.random.uniform(k_w1, (n, n), dtype=jnp.float32),
    ]

    out, emb1, emb2, c0, c1 = fagcn_forward(params, x, adj_hat_list, adj_wave_list)
    jax.block_until_ready((out, emb1, emb2, c0, c1))

    assert out.shape == (n, hidden_dims[-1])
    assert emb1.shape == (n, hidden_dims[-1])
    assert emb2.shape == (n, hidden_dims[-1])

    # Validate against the f32 reference (bf16 adjacencies + bf16 MXU operands
    # bound the error to ~1% relative; 3e-2 tolerance as before).
    ref_out, ref_e1, ref_e2 = fagcn_reference(params, x, adj_hat_list, adj_wave_list)

    def rel_err(got, want):
        return float(jnp.linalg.norm(got - want) / (jnp.linalg.norm(want) + 1e-6))

    assert rel_err(out, ref_out) < 3e-2, rel_err(out, ref_out)
    assert rel_err(emb1, ref_e1) < 3e-2, rel_err(emb1, ref_e1)
    assert rel_err(emb2, ref_e2) < 3e-2, rel_err(emb2, ref_e2)

    print("KERNEL_OK")
</pallas_src>

<mosaic_0001>
module attributes {stable_mosaic.version = 11 : i64} {
  func.func @_fagcn_fused_kernel(%arg0: memref<2xf32, #tpu.memory_space<smem>>, %arg1: memref<2xf32, #tpu.memory_space<smem>>, %arg2: memref<2xf32, #tpu.memory_space<smem>>, %arg3: memref<2x128x128xbf16, #tpu.memory_space<vmem>>, %arg4: memref<2x128x128xbf16, #tpu.memory_space<vmem>>, %arg5: memref<128x32xf32, #tpu.memory_space<vmem>>, %arg6: memref<32x64xf32, #tpu.memory_space<vmem>>, %arg7: memref<64x16xf32, #tpu.memory_space<vmem>>, %arg8: memref<3x128x16xf32, #tpu.memory_space<vmem>>, %arg9: memref<256x128xbf16, #tpu.memory_space<vmem>>, %arg10: memref<256x64xbf16, #tpu.memory_space<vmem>>) attributes {dimension_semantics = [], scalar_prefetch = 0 : i64, scratch_operands = 2 : i64, tpu.core_type = #tpu.core_type<tc>} {
    %cst = arith.constant 0.000000e+00 : f32
    %0 = vector.broadcast %cst : f32 to vector<128x128xf32>
    %c0 = arith.constant 0 : index
    %1 = memref.load %arg0[%c0] : memref<2xf32, #tpu.memory_space<smem>>
    %c0_0 = arith.constant 0 : index
    %c0_1 = arith.constant 0 : index
    %c0_2 = arith.constant 0 : index
    %2 = vector.load %arg3[%c0_0, %c0_1, %c0_2] : memref<2x128x128xbf16, #tpu.memory_space<vmem>>, vector<1x128x128xbf16>
    %3 = vector.shape_cast %2 : vector<1x128x128xbf16> to vector<128x128xbf16>
    %4 = arith.extf %3 : vector<128x128xbf16> to vector<128x128xf32>
    %5 = vector.broadcast %1 : f32 to vector<128x128xf32>
    %6 = arith.mulf %5, %4 : vector<128x128xf32>
    %7 = arith.addf %0, %6 : vector<128x128xf32>
    %c1 = arith.constant 1 : index
    %8 = memref.load %arg0[%c1] : memref<2xf32, #tpu.memory_space<smem>>
    %c1_3 = arith.constant 1 : index
    %c0_4 = arith.constant 0 : index
    %c0_5 = arith.constant 0 : index
    %9 = vector.load %arg3[%c1_3, %c0_4, %c0_5] : memref<2x128x128xbf16, #tpu.memory_space<vmem>>, vector<1x128x128xbf16>
    %10 = vector.shape_cast %9 : vector<1x128x128xbf16> to vector<128x128xbf16>
    %11 = arith.extf %10 : vector<128x128xbf16> to vector<128x128xf32>
    %12 = vector.broadcast %8 : f32 to vector<128x128xf32>
    %13 = arith.mulf %12, %11 : vector<128x128xf32>
    %14 = arith.addf %7, %13 : vector<128x128xf32>
    %15 = arith.truncf %14 : vector<128x128xf32> to vector<128x128xbf16>
    %c0_6 = arith.constant 0 : index
    %c0_7 = arith.constant 0 : index
    %16 = vector.load %arg9[%c0_6, %c0_7] : memref<256x128xbf16, #tpu.memory_space<vmem>>, vector<128x128xbf16>
    tpu.vector_store %arg9[%c0_6, %c0_7], %15 {strides = array<i32>} : memref<256x128xbf16, #tpu.memory_space<vmem>>, vector<128x128xbf16>,
    %cst_8 = arith.constant 0.000000e+00 : f32
    %17 = vector.broadcast %cst_8 : f32 to vector<128x128xf32>
    %c0_9 = arith.constant 0 : index
    %18 = memref.load %arg1[%c0_9] : memref<2xf32, #tpu.memory_space<smem>>
    %c0_10 = arith.constant 0 : index
    %c0_11 = arith.constant 0 : index
    %c0_12 = arith.constant 0 : index
    %19 = vector.load %arg4[%c0_10, %c0_11, %c0_12] : memref<2x128x128xbf16, #tpu.memory_space<vmem>>, vector<1x128x128xbf16>
    %20 = vector.shape_cast %19 : vector<1x128x128xbf16> to vector<128x128xbf16>
    %21 = arith.extf %20 : vector<128x128xbf16> to vector<128x128xf32>
    %22 = vector.broadcast %18 : f32 to vector<128x128xf32>
    %23 = arith.mulf %22, %21 : vector<128x128xf32>
    %24 = arith.addf %17, %23 : vector<128x128xf32>
    %c1_13 = arith.constant 1 : index
    %25 = memref.load %arg1[%c1_13] : memref<2xf32, #tpu.memory_space<smem>>
    %c1_14 = arith.constant 1 : index
    %c0_15 = arith.constant 0 : index
    %c0_16 = arith.constant 0 : index
    %26 = vector.load %arg4[%c1_14, %c0_15, %c0_16] : memref<2x128x128xbf16, #tpu.memory_space<vmem>>, vector<1x128x128xbf16>
    %27 = vector.shape_cast %26 : vector<1x128x128xbf16> to vector<128x128xbf16>
    %28 = arith.extf %27 : vector<128x128xbf16> to vector<128x128xf32>
    %29 = vector.broadcast %25 : f32 to vector<128x128xf32>
    %30 = arith.mulf %29, %28 : vector<128x128xf32>
    %31 = arith.addf %24, %30 : vector<128x128xf32>
    %32 = arith.truncf %31 : vector<128x128xf32> to vector<128x128xbf16>
    %c128 = arith.constant 128 : index
    %c0_17 = arith.constant 0 : index
    %33 = vector.load %arg9[%c128, %c0_17] : memref<256x128xbf16, #tpu.memory_space<vmem>>, vector<128x128xbf16>
    tpu.vector_store %arg9[%c128, %c0_17], %32 {strides = array<i32>} : memref<256x128xbf16, #tpu.memory_space<vmem>>, vector<128x128xbf16>,
    %c0_18 = arith.constant 0 : index
    %c0_19 = arith.constant 0 : index
    %34 = vector.load %arg5[%c0_18, %c0_19] : memref<128x32xf32, #tpu.memory_space<vmem>>, vector<128x32xf32>
    %35 = arith.truncf %34 : vector<128x32xf32> to vector<128x32xbf16>
    %c0_20 = arith.constant 0 : index
    %c0_21 = arith.constant 0 : index
    %36 = vector.load %arg6[%c0_20, %c0_21] : memref<32x64xf32, #tpu.memory_space<vmem>>, vector<32x64xf32>
    %37 = arith.truncf %36 : vector<32x64xf32> to vector<32x64xbf16>
    %cst_22 = arith.constant dense<0.000000e+00> : vector<128x64xf32>
    %38 = tpu.matmul %35, %37, %cst_22 {dimension_numbers = #tpu.dot_dimension_numbers<[1], [0], [0], [1], [0, 0, 1, 1], [], []>} : vector<128x32xbf16>, vector<32x64xbf16>, vector<128x64xf32> -> vector<128x64xf32>
    %39 = arith.truncf %38 : vector<128x64xf32> to vector<128x64xbf16>
    %c0_23 = arith.constant 0 : index
    %c0_24 = arith.constant 0 : index
    %40 = vector.load %arg9[%c0_23, %c0_24] : memref<256x128xbf16, #tpu.memory_space<vmem>>, vector<256x128xbf16>
    %cst_25 = arith.constant dense<0.000000e+00> : vector<256x64xf32>
    %41 = tpu.matmul %40, %39, %cst_25 {dimension_numbers = #tpu.dot_dimension_numbers<[1], [0], [0], [1], [0, 0, 1, 1], [], []>} : vector<256x128xbf16>, vector<128x64xbf16>, vector<256x64xf32> -> vector<256x64xf32>
    %cst_26 = arith.constant 0.000000e+00 : f32
    %42 = vector.broadcast %cst_26 : f32 to vector<256x64xf32>
    %43 = arith.maximumf %41, %42 : vector<256x64xf32>
    %44 = arith.truncf %43 : vector<256x64xf32> to vector<256x64xbf16>
    %c0_27 = arith.constant 0 : index
    %c0_28 = arith.constant 0 : index
    %45 = vector.load %arg10[%c0_27, %c0_28] : memref<256x64xbf16, #tpu.memory_space<vmem>>, vector<256x64xbf16>
    tpu.vector_store %arg10[%c0_27, %c0_28], %44 {strides = array<i32>} : memref<256x64xbf16, #tpu.memory_space<vmem>>, vector<256x64xbf16>,
    %c0_29 = arith.constant 0 : index
    %c0_30 = arith.constant 0 : index
    %46 = vector.load %arg7[%c0_29, %c0_30] : memref<64x16xf32, #tpu.memory_space<vmem>>, vector<64x16xf32>
    %47 = arith.truncf %46 : vector<64x16xf32> to vector<64x16xbf16>
    %c0_31 = arith.constant 0 : index
    %c0_32 = arith.constant 0 : index
    %48 = vector.load %arg10[%c0_31, %c0_32] : memref<256x64xbf16, #tpu.memory_space<vmem>>, vector<256x64xbf16>
    %cst_33 = arith.constant dense<0.000000e+00> : vector<256x16xf32>
    %49 = tpu.matmul %48, %47, %cst_33 {dimension_numbers = #tpu.dot_dimension_numbers<[1], [0], [0], [1], [0, 0, 1, 1], [], []>} : vector<256x64xbf16>, vector<64x16xbf16>, vector<256x16xf32> -> vector<256x16xf32>
    %50 = arith.truncf %49 : vector<256x16xf32> to vector<256x16xbf16>
    %c0_34 = arith.constant 0 : index
    %c0_35 = arith.constant 0 : index
    %51 = vector.load %arg9[%c0_34, %c0_35] : memref<256x128xbf16, #tpu.memory_space<vmem>>, vector<128x128xbf16>
    %52 = vector.extract_strided_slice %50 {offsets = [0, 0], sizes = [128, 16], strides = [1, 1]} : vector<256x16xbf16> to vector<128x16xbf16>
    %cst_36 = arith.constant dense<0.000000e+00> : vector<128x16xf32>
    %53 = tpu.matmul %51, %52, %cst_36 {dimension_numbers = #tpu.dot_dimension_numbers<[1], [0], [0], [1], [0, 0, 1, 1], [], []>} : vector<128x128xbf16>, vector<128x16xbf16>, vector<128x16xf32> -> vector<128x16xf32>
    %c128_37 = arith.constant 128 : index
    %c0_38 = arith.constant 0 : index
    %54 = vector.load %arg9[%c128_37, %c0_38] : memref<256x128xbf16, #tpu.memory_space<vmem>>, vector<128x128xbf16>
    %55 = vector.extract_strided_slice %50 {offsets = [128, 0], sizes = [128, 16], strides = [1, 1]} : vector<256x16xbf16> to vector<128x16xbf16>
    %cst_39 = arith.constant dense<0.000000e+00> : vector<128x16xf32>
    %56 = tpu.matmul %54, %55, %cst_39 {dimension_numbers = #tpu.dot_dimension_numbers<[1], [0], [0], [1], [0, 0, 1, 1], [], []>} : vector<128x128xbf16>, vector<128x16xbf16>, vector<128x16xf32> -> vector<128x16xf32>
    %c0_40 = arith.constant 0 : index
    %57 = memref.load %arg2[%c0_40] : memref<2xf32, #tpu.memory_space<smem>>
    %58 = vector.broadcast %57 : f32 to vector<128x16xf32>
    %59 = arith.mulf %58, %53 : vector<128x16xf32>
    %c1_41 = arith.constant 1 : index
    %60 = memref.load %arg2[%c1_41] : memref<2xf32, #tpu.memory_space<smem>>
    %61 = vector.broadcast %60 : f32 to vector<128x16xf32>
    %62 = arith.mulf %61, %56 : vector<128x16xf32>
    %63 = arith.addf %59, %62 : vector<128x16xf32>
    %c0_42 = arith.constant 0 : index
    %c0_43 = arith.constant 0 : index
    %c0_44 = arith.constant 0 : index
    %64 = vector.load %arg8[%c0_42, %c0_43, %c0_44] : memref<3x128x16xf32, #tpu.memory_space<vmem>>, vector<1x128x16xf32>
    %65 = vector.shape_cast %64 : vector<1x128x16xf32> to vector<128x16xf32>
    %66 = vector.shape_cast %63 : vector<128x16xf32> to vector<1x128x16xf32>
    tpu.vector_store %arg8[%c0_42, %c0_43, %c0_44], %66 {strides = array<i32>} : memref<3x128x16xf32, #tpu.memory_space<vmem>>, vector<1x128x16xf32>,
    %c1_45 = arith.constant 1 : index
    %c0_46 = arith.constant 0 : index
    %c0_47 = arith.constant 0 : index
    %67 = vector.load %arg8[%c1_45, %c0_46, %c0_47] : memref<3x128x16xf32, #tpu.memory_space<vmem>>, vector<1x128x16xf32>
    %68 = vector.shape_cast %67 : vector<1x128x16xf32> to vector<128x16xf32>
    %69 = vector.shape_cast %53 : vector<128x16xf32> to vector<1x128x16xf32>
    tpu.vector_store %arg8[%c1_45, %c0_46, %c0_47], %69 {strides = array<i32>} : memref<3x128x16xf32, #tpu.memory_space<vmem>>, vector<1x128x16xf32>,
    %c2 = arith.constant 2 : index
    %c0_48 = arith.constant 0 : index
    %c0_49 = arith.constant 0 : index
    %70 = vector.load %arg8[%c2, %c0_48, %c0_49] : memref<3x128x16xf32, #tpu.memory_space<vmem>>, vector<1x128x16xf32>
    %71 = vector.shape_cast %70 : vector<1x128x16xf32> to vector<128x16xf32>
    %72 = vector.shape_cast %56 : vector<128x16xf32> to vector<1x128x16xf32>
    tpu.vector_store %arg8[%c2, %c0_48, %c0_49], %72 {strides = array<i32>} : memref<3x128x16xf32, #tpu.memory_space<vmem>>, vector<1x128x16xf32>,
    return
  }
}

</mosaic_0001>

<bundles_post_ra>
// kernel: tpu_custom_call.1
= control target key start
LH: loop header
LB: loop body
LE: loop exit
PB: predicated region body
PF: predicated region fallthrough
CT: control target
= control target key end

     0   :  { %13 = vsyncpa [#allocation6], 0  ;;  %s3400_s0 = inlined_call_operand.vmem [shape: f32[2], index: 0, kind: input, shape index: {}]   ;;  %s3401_s1 = inlined_call_operand.vmem [shape: f32[2], index: 1, kind: input, shape index: {}]   ;;  %s3402_s2 = inlined_call_operand.vmem [shape: f32[2], index: 2, kind: input, shape index: {}]   ;;  %s3403_s3 = inlined_call_operand.vmem [shape: bf16[2,128,128], index: 3, kind: input, shape index: {}]   ;;  %s3404_s4 = inlined_call_operand.hbm [shape: bf16[2,128,128], index: 4, kind: input, shape index: {}]   ;;  %s3405_s5 = inlined_call_operand.vmem [shape: f32[128,32], index: 5, kind: input, shape index: {}]   ;;  %s3406_s6 = inlined_call_operand.vmem [shape: f32[32,64], index: 6, kind: input, shape index: {}]   ;;  %s3407_s7 = inlined_call_operand.vmem [shape: f32[64,16], index: 7, kind: input, shape index: {}]   ;;  %s3408_s8 = inlined_call_operand.vmem [shape: f32[3,128,16], index: 8, kind: output, shape index: {}]  }
   0x1   :  { %14 = vsyncpa [#allocation8], 0  ;;  %s32_s29 = sshll.u32 %s3401_s1, 4  ;;  %s33_s29 = int_to_ptr.vmem [resolvable:$true] %s32_s29 }
   0x2   :  { %15 = vsyncpa [#allocation5], 0  ;;  %s22_s10 = sshll.u32 %s3400_s0, 4  ;;  %s2745_s11 = scalar_lea.vmem %s33_s29, 16  ;;  %s23_s10 = int_to_ptr.vmem [resolvable:$true] %s22_s10 }
   0x3   :  { %p2746_p0 = scmp.ne.s32.totalorder %s33_s29, %s2745_s11  ;;  %p2750_p1 = scmp.lt.s32.totalorder %s33_s29, %s33_s29 }
   0x4   :  { %p2751_p2 = scmp.lt.s32.totalorder %s2745_s11, %s2745_s11 }
   0x6   :  { %p2752_p3 = por %p2751_p2, %p2750_p1 }
   0x8   :  { %p2753_p4 = pnand %p2752_p3, %p2746_p0 }
   0xa   :  { %2756 = shalt.err (!%p2753_p4)
}
   0xb   :  { %s2807_s12 = smov [#allocation7]   ;;  %s2757_s13 = scalar_lea.vmem %s23_s10, 16 }
   0xc   :  { %35 = dma.vmem_to_smem %s33_s29, 16, %s2807_s12, [#allocation8]  }
   0xd   :  { %p2758_p5 = scmp.ne.s32.totalorder %s23_s10, %s2757_s13  ;;  %p2762_p6 = scmp.lt.s32.totalorder %s23_s10, %s23_s10 }
   0xe   :  { %p2763_p7 = scmp.lt.s32.totalorder %s2757_s13, %s2757_s13 }
  0x10   :  { %p2764_p8 = por %p2763_p7, %p2762_p6 }
  0x12   :  { %p2765_p9 = pnand %p2764_p8, %p2758_p5 }
  0x14   :  { %2768 = shalt.err (!%p2765_p9)
}
  0x15   :  { %s2808_s1 = smov [#allocation4]   ;;  %s42_s15 = sshll.u32 %s3402_s2, 4  ;;  %s43_s15 = int_to_ptr.vmem [resolvable:$true] %s42_s15 }
  0x16   :  { %25 = dma.vmem_to_smem %s23_s10, 16, %s2808_s1, [#allocation6]  }
  0x17   :  { %s2769_s16 = scalar_lea.vmem %s43_s15, 16  ;;  %p2774_p11 = scmp.lt.s32.totalorder %s43_s15, %s43_s15 }
  0x18   :  { %p2770_p10 = scmp.ne.s32.totalorder %s43_s15, %s2769_s16  ;;  %p2775_p12 = scmp.lt.s32.totalorder %s2769_s16, %s2769_s16 }
  0x1a   :  { %p2776_p13 = por %p2775_p12, %p2774_p11 }
  0x1c   :  { %p2777_p0 = pnand %p2776_p13, %p2770_p10 }
  0x1e   :  { %2780 = shalt.err (!%p2777_p0)
}
  0x1f   :  { %s2809_s17 = smov [#allocation9]   ;;  %s2810_s18 = smov [#allocation10]  }
  0x20   :  { %45 = dma.vmem_to_smem %s43_s15, 16, %s2809_s17, [#allocation8]  }
  0x21   :  { %s53_s19 = sshll.u32 %s2810_s18, 4  ;;  %s54_s19 = int_to_ptr.vmem [resolvable:$true] %s53_s19 }
  0x22   :  { %s2789_s20 = scalar_lea.vmem %s54_s19, 2048  ;;  %p2794_p2 = scmp.lt.s32.totalorder %s54_s19, %s54_s19 }
  0x23   :  { %p2790_p1 = scmp.ne.s32.totalorder %s54_s19, %s2789_s20  ;;  %p2795_p3 = scmp.lt.s32.totalorder %s2789_s20, %s2789_s20 }
  0x25   :  { %p2796_p4 = por %p2795_p3, %p2794_p2 }
  0x27   :  { %p2797_p5 = pnand %p2796_p4, %p2790_p1 }
  0x29   :  { %2800 = shalt.err (!%p2797_p5)
}
  0x2a   :  { %s2811_s2 = smov 64   ;;  %s2812_s21 = smov 4  }
  0x2b   :  { %59 = dma.hbm_to_vmem [thread:$0]  %s3404_s4, 2048, %s54_s19, [#allocation5], %s2811_s2, %s2811_s2, %s2812_s21  }
  0x2c   :  { %2801 = dma.done.wait [#allocation6], 16  }
  0x2d   :  { %2802 = vsyncadd [#allocation6], 4294967280 }
  0x2e   :  { %2803 = dma.done.wait [#allocation8], 32  }
  0x2f   :  { %2804 = vsyncadd [#allocation8], 4294967264 }
  0x30   :  { %2805 = dma.done.wait [#allocation5], 2048  }
  0x31   :  { %2806 = vsyncadd [#allocation5], 4294965248 }
  0x32   :  { %78 = sfence }
  0x33   :  { %v532_v0 = vld [vmem:[%s3406_s6 + $0x10] sm:$0xff]  ;;  %v533_v1 = vld [vmem:[%s3406_s6 + $0x18] sm:$0xff]  ;;  %v530_v2 = vld [vmem:[%s3406_s6] sm:$0xff]  ;;  %vm536_vm0 = vcmask 261120   ;;  %s80_s1 = sld [smem:[#allocation4]]  ;;  %vm1115_vm1 = vcmask 519168  }
  0x34   :  { %v535_v3 = vpack.c.bf16 %v533_v1, %v532_v0  ;;  %v531_v4 = vld [vmem:[%s3406_s6 + $0x8] sm:$0xff]  ;;  %v506_v5 = vld [vmem:[%s3405_s5] sm:$0xff]  ;;  %v508_v9 = vld [vmem:[%s3405_s5 + $0x10] sm:$0xff]  ;;  %s1930_s6 = sld [smem:[#allocation4 + $0x1]]  ;;  %vm1272_vm2 = vcmask 523264   ;;  %vm1872_vm3 = vcmask 130048  }
  0x35   :  { %v507_v6 = vld [vmem:[%s3405_s5 + $0x8] sm:$0xff]  ;;  %v534_v7 = vpack.c.bf16 %v531_v4, %v530_v2  ;;  %v509_v10 = vld [vmem:[%s3405_s5 + $0x18] sm:$0xff]  ;;  %v510_v11 = vld [vmem:[%s3405_s5 + $0x20] sm:$0xff]  ;;  %s293_s17 = sld [smem:[#allocation7]] }
  0x36   :  { %v522_v8 = vpack.c.bf16 %v507_v6, %v506_v5  ;;  %2519 = vmatprep.subr.bf16.mxu0 %v535_v3  ;;  %v511_v12 = vld [vmem:[%s3405_s5 + $0x28] sm:$0xff]  ;;  %v523_v13 = vpack.c.bf16 %v509_v10, %v508_v9  ;;  %v512_v15 = vld [vmem:[%s3405_s5 + $0x30] sm:$0xff]  ;;  %v513_v16 = vld [vmem:[%s3405_s5 + $0x38] sm:$0xff]  ;;  %s1963_s18 = sld [smem:[#allocation7 + $0x1]] }
  0x37   :  { %2520 = vmatpush3.bf16.msra.mxu0 %v535_v3  ;;  %v524_v14 = vpack.c.bf16 %v511_v12, %v510_v11  ;;  %v514_v17 = vld [vmem:[%s3405_s5 + $0x40] sm:$0xff]  ;;  %v515_v18 = vld [vmem:[%s3405_s5 + $0x48] sm:$0xff]  ;;  %v525_v19 = vpack.c.bf16 %v513_v16, %v512_v15  ;;  %v516_v21 = vld [vmem:[%s3405_s5 + $0x50] sm:$0xff]  ;;  %s1820_s22 = sld [smem:[#allocation9]] }
  0x38   :  { %2523 = vmatprep.mubr.msk.bf16.mxu0 %vm536_vm0, %v522_v8  ;;  %2521 = vmatprep.subr.bf16.mxu0 %v534_v7  ;;  %v526_v20 = vpack.c.bf16 %v515_v18, %v514_v17  ;;  %v517_v22 = vld [vmem:[%s3405_s5 + $0x58] sm:$0xff]  ;;  %v518_v23 = vld [vmem:[%s3405_s5 + $0x60] sm:$0xff]  ;;  %v519_v24 = vld [vmem:[%s3405_s5 + $0x68] sm:$0xff]  ;;  %s2084_s25 = sld [smem:[#allocation9 + $0x1]] }
  0x39   :  { %v527_v25 = vpack.c.bf16 %v517_v22, %v516_v21  ;;  %v528_v26 = vpack.c.bf16 %v519_v24, %v518_v23  ;;  %v520_v27 = vld [vmem:[%s3405_s5 + $0x70] sm:$0xff]  ;;  %v521_v28 = vld [vmem:[%s3405_s5 + $0x78] sm:$0xff]  ;;  %v2182_v30 = vld [vmem:[%s3403_s3] sm:$0xff]   ;;  %v2950_v38 = vstv %s80_s1 }
  0x3a   :  { %v529_v29 = vpack.c.bf16 %v521_v28, %v520_v27  ;;  %v2396_v31 = vld [vmem:[%s3403_s3 + $0x40] sm:$0xff]   ;;  %v2183_v32 = vunpack.c.l.bf16 %v2182_v30  ;;  %v2184_v33 = vunpack.c.h.bf16 %v2182_v30  ;;  %v2389_v36 = vld [vmem:[%s3403_s3 + $0x8] sm:$0xff]   ;;  %v2954_v44 = vstv %s1930_s6  ;;  %v2390_v57 = vld [vmem:[%s3403_s3 + $0x10] sm:$0xff]  }
  0x3b   :  { %2522 = vmatpush3.bf16.msra.mxu0 %v534_v7  ;;  %v2215_v34 = vunpack.c.l.bf16 %v2396_v31  ;;  %v2216_v35 = vunpack.c.h.bf16 %v2396_v31  ;;  %v2397_v37 = vld [vmem:[%s3403_s3 + $0x48] sm:$0xff]   ;;  %v2187_v39 = vunpack.c.l.bf16 %v2389_v36  ;;  %v2188_v40 = vunpack.c.h.bf16 %v2389_v36  ;;  %v2398_v58 = vld [vmem:[%s3403_s3 + $0x50] sm:$0xff]   ;;  %v2391_v63 = vld [vmem:[%s3403_s3 + $0x18] sm:$0xff]  }
  0x3c   :  { %v2219_v41 = vunpack.c.l.bf16 %v2397_v37  ;;  %v114_v42 = vmul.f32 %v2183_v32, %v2950_v38  ;;  %v115_v43 = vmul.f32 %v2184_v33, %v2950_v38  ;;  %v2220_v45 = vunpack.c.h.bf16 %v2397_v37  ;;  %v2399_v0 = vld [vmem:[%s3403_s3 + $0x58] sm:$0xff]   ;;  %v2393_v30 = vld [vmem:[%s3403_s3 + $0x28] sm:$0xff]  }
  0x3d   :  { %v181_v46 = vmul.f32 %v2215_v34, %v2954_v44  ;;  %v182_v47 = vmul.f32 %v2216_v35, %v2954_v44  ;;  %v116_v48 = vmul.f32 %v2187_v39, %v2950_v38  ;;  %v117_v49 = vmul.f32 %v2188_v40, %v2950_v38  ;;  %v2401_v31 = vld [vmem:[%s3403_s3 + $0x68] sm:$0xff]  }
  0x3e   :  { %2524 = vmatmul.mubr.msk.bf16.vlgmr.msra.gmra.mxu0 %vm536_vm0, %v523_v13  ;;  %v183_v50 = vmul.f32 %v2219_v41, %v2954_v44  ;;  %v184_v51 = vmul.f32 %v2220_v45, %v2954_v44  ;;  %v2191_v60 = vunpack.c.l.bf16 %v2390_v57  ;;  %v2192_v61 = vunpack.c.h.bf16 %v2390_v57 }
  0x3f   :  { %2527 = vmatprep.mubr.msk.bf16.mxu0 %vm536_vm0, %v524_v14  ;;  %v197_v52 = vadd.f32 %v181_v46, %v114_v42  ;;  %v198_v53 = vadd.f32 %v182_v47, %v115_v43  ;;  %v2223_v62 = vunpack.c.l.bf16 %v2398_v58  ;;  %v2224_v1 = vunpack.c.h.bf16 %v2398_v58  ;;  %v2394_v47 = vld [vmem:[%s3403_s3 + $0x30] sm:$0xff]   ;;  %v2395_v58 = vld [vmem:[%s3403_s3 + $0x38] sm:$0xff]  }
  0x40   :  { %v199_v54 = vadd.f32 %v183_v50, %v116_v48  ;;  %v200_v55 = vadd.f32 %v184_v51, %v117_v49  ;;  %v2195_v2 = vunpack.c.l.bf16 %v2391_v63  ;;  %v2196_v3 = vunpack.c.h.bf16 %v2391_v63  ;;  %v2402_v48 = vld [vmem:[%s3403_s3 + $0x70] sm:$0xff]  }
  0x41   :  { %v2248_v56 = vpack.c.bf16 %v198_v53, %v197_v52  ;;  %v2227_v4 = vunpack.c.l.bf16 %v2399_v0  ;;  %v118_v5 = vmul.f32 %v2191_v60, %v2950_v38  ;;  %v119_v6 = vmul.f32 %v2192_v61, %v2950_v38 }
  0x42   :  { %v2253_v59 = vpack.c.bf16 %v200_v55, %v199_v54  ;;  %v185_v7 = vmul.f32 %v2223_v62, %v2954_v44  ;;  %v2228_v8 = vunpack.c.h.bf16 %v2399_v0  ;;  %v186_v9 = vmul.f32 %v2224_v1, %v2954_v44 }
  0x43   :  { %2249 = vst [vmem:[#allocation2] sm:$0xff] %v2248_v56   ;;  %v120_v10 = vmul.f32 %v2195_v2, %v2950_v38  ;;  %v121_v11 = vmul.f32 %v2196_v3, %v2950_v38  ;;  %v187_v12 = vmul.f32 %v2227_v4, %v2954_v44  ;;  %v2203_v33 = vunpack.c.l.bf16 %v2393_v30 }
  0x44   :  { %2404 = vst [vmem:[#allocation2 + $0x8] sm:$0xff] %v2253_v59   ;;  %v201_v13 = vadd.f32 %v185_v7, %v118_v5  ;;  %v188_v14 = vmul.f32 %v2228_v8, %v2954_v44  ;;  %v202_v15 = vadd.f32 %v186_v9, %v119_v6  ;;  %v2204_v34 = vunpack.c.h.bf16 %v2393_v30  ;;  %v2403_v59 = vld [vmem:[%s3403_s3 + $0x78] sm:$0xff]   ;;  %v2286_v9 = vld [vmem:[#allocation10] sm:$0xff]  }
  0x45   :  { %v203_v16 = vadd.f32 %v187_v12, %v120_v10  ;;  %v2235_v35 = vunpack.c.l.bf16 %v2401_v31  ;;  %v2236_v37 = vunpack.c.h.bf16 %v2401_v31  ;;  %v124_v40 = vmul.f32 %v2203_v33, %v2950_v38  ;;  %v2318_v10 = vld [vmem:[#allocation10 + $0x40] sm:$0xff]  }
  0x46   :  { %2528 = vmatmul.mubr.msk.bf16.gmra.mxu0 %vm536_vm0, %v525_v19  ;;  %v204_v17 = vadd.f32 %v188_v14, %v121_v11  ;;  %v2258_v18 = vpack.c.bf16 %v202_v15, %v201_v13  ;;  %v2392_v19 = vld [vmem:[%s3403_s3 + $0x20] sm:$0xff]   ;;  %v125_v41 = vmul.f32 %v2204_v34, %v2950_v38  ;;  %v2207_v50 = vunpack.c.l.bf16 %v2394_v47  ;;  %v2412_v34 = vld [vmem:[#allocation10 + $0x10] sm:$0xff]  }
  0x47   :  { %2531 = vmatprep.mubr.msk.bf16.mxu0 %vm536_vm0, %v526_v20  ;;  %v2400_v20 = vld [vmem:[%s3403_s3 + $0x60] sm:$0xff]   ;;  %v2199_v23 = vunpack.c.l.bf16 %v2392_v19  ;;  %v2200_v24 = vunpack.c.h.bf16 %v2392_v19  ;;  %v191_v42 = vmul.f32 %v2235_v35, %v2954_v44  ;;  %v192_v43 = vmul.f32 %v2236_v37, %v2954_v44  ;;  %v2419_v35 = vld [vmem:[#allocation10 + $0x50] sm:$0xff]  }
  0x48   :  { %v2263_v22 = vpack.c.bf16 %v204_v17, %v203_v16  ;;  %2405 = vst [vmem:[#allocation2 + $0x10] sm:$0xff] %v2258_v18   ;;  %v2208_v51 = vunpack.c.h.bf16 %v2394_v47  ;;  %v2239_v52 = vunpack.c.l.bf16 %v2402_v48  ;;  %v2240_v53 = vunpack.c.h.bf16 %v2402_v48  ;;  %v2411_v17 = vld [vmem:[#allocation10 + $0x8] sm:$0xff]  }
  0x49   :  { %v122_v27 = vmul.f32 %v2199_v23, %v2950_v38  ;;  %v123_v28 = vmul.f32 %v2200_v24, %v2950_v38  ;;  %v207_v46 = vadd.f32 %v191_v42, %v124_v40  ;;  %v208_v49 = vadd.f32 %v192_v43, %v125_v41  ;;  %v2418_v18 = vld [vmem:[#allocation10 + $0x48] sm:$0xff]   ;;  %v2413_v43 = vld [vmem:[#allocation10 + $0x18] sm:$0xff]  }
  0x4a   :  { %v2697_v21 = vld [vmem:[#allocation2] sm:$0xff]   ;;  %2406 = vst [vmem:[#allocation2 + $0x18] sm:$0xff] %v2263_v22   ;;  %v126_v55 = vmul.f32 %v2207_v50, %v2950_v38  ;;  %v127_v56 = vmul.f32 %v2208_v51, %v2950_v38  ;;  %v193_v57 = vmul.f32 %v2239_v52, %v2954_v44  ;;  %v194_v60 = vmul.f32 %v2240_v53, %v2954_v44 }
  0x4b   :  { %2555 = vmatprep.mubr.bf16.mxu1 %v2697_v21  ;;  %v2273_v54 = vpack.c.bf16 %v208_v49, %v207_v46  ;;  %v2211_v61 = vunpack.c.l.bf16 %v2395_v58  ;;  %v2212_v62 = vunpack.c.h.bf16 %v2395_v58  ;;  %v2243_v63 = vunpack.c.l.bf16 %v2403_v59 }
  0x4c   :  { %v209_v0 = vadd.f32 %v193_v57, %v126_v55  ;;  %v2244_v1 = vunpack.c.h.bf16 %v2403_v59  ;;  %v210_v2 = vadd.f32 %v194_v60, %v127_v56  ;;  %v2287_v12 = vunpack.c.l.bf16 %v2286_v9 }
  0x4d   :  { %2408 = vst [vmem:[#allocation2 + $0x28] sm:$0xff] %v2273_v54   ;;  %v128_v3 = vmul.f32 %v2211_v61, %v2950_v38  ;;  %v129_v4 = vmul.f32 %v2212_v62, %v2950_v38  ;;  %v195_v5 = vmul.f32 %v2243_v63, %v2954_v44  ;;  %v2288_v13 = vunpack.c.h.bf16 %v2286_v9  ;;  %v2414_v63 = vld [vmem:[#allocation10 + $0x20] sm:$0xff]  }
  0x4e   :  { %2532 = vmatmul.mubr.msk.bf16.gmra.mxu0 %vm536_vm0, %v527_v25  ;;  %v2231_v25 = vunpack.c.l.bf16 %v2400_v20  ;;  %v196_v6 = vmul.f32 %v2244_v1, %v2954_v44  ;;  %v2278_v7 = vpack.c.bf16 %v210_v2, %v209_v0  ;;  %v2319_v14 = vunpack.c.l.bf16 %v2318_v10  ;;  %v2421_v0 = vld [vmem:[#allocation10 + $0x60] sm:$0xff]  }
  0x4f   :  { %2535 = vmatprep.mubr.msk.bf16.mxu0 %vm536_vm0, %v528_v26  ;;  %v2232_v26 = vunpack.c.h.bf16 %v2400_v20  ;;  %v211_v8 = vadd.f32 %v195_v5, %v128_v3  ;;  %v3022_v15 = vstv %s293_s17  ;;  %v2320_v16 = vunpack.c.h.bf16 %v2318_v10 }
  0x50   :  { %v212_v11 = vadd.f32 %v196_v6, %v129_v4  ;;  %2409 = vst [vmem:[#allocation2 + $0x30] sm:$0xff] %v2278_v7   ;;  %v327_v38 = vmul.f32 %v2287_v12, %v3022_v15  ;;  %v328_v20 = vmul.f32 %v2288_v13, %v3022_v15  ;;  %v2291_v23 = vunpack.c.l.bf16 %v2411_v17  ;;  %v2415_v6 = vld [vmem:[#allocation10 + $0x28] sm:$0xff]  }
  0x51   :  { %v190_v32 = vmul.f32 %v2232_v26, %v2954_v44  ;;  %v2292_v24 = vunpack.c.h.bf16 %v2411_v17  ;;  %v2324_v26 = vunpack.c.h.bf16 %v2418_v18  ;;  %v2296_v40 = vunpack.c.h.bf16 %v2412_v34  ;;  %v2422_v7 = vld [vmem:[#allocation10 + $0x68] sm:$0xff]  }
  0x52   :  { %v2283_v19 = vpack.c.bf16 %v212_v11, %v211_v8  ;;  %v2327_v41 = vunpack.c.l.bf16 %v2419_v35  ;;  %v2328_v42 = vunpack.c.h.bf16 %v2419_v35  ;;  %v2299_v49 = vunpack.c.l.bf16 %v2413_v43 }
  0x53   :  { %v206_v39 = vadd.f32 %v190_v32, %v123_v28  ;;  %v330_v30 = vmul.f32 %v2292_v24, %v3022_v15  ;;  %v332_v48 = vmul.f32 %v2296_v40, %v3022_v15  ;;  %v2300_v52 = vunpack.c.h.bf16 %v2413_v43 }
  0x54   :  { %2410 = vst [vmem:[#allocation2 + $0x38] sm:$0xff] %v2283_v19   ;;  %v333_v54 = vmul.f32 %v2299_v49, %v3022_v15  ;;  %v2303_v2 = vunpack.c.l.bf16 %v2414_v63  ;;  %v2304_v3 = vunpack.c.h.bf16 %v2414_v63  ;;  %v2335_v4 = vunpack.c.l.bf16 %v2421_v0 }
  0x55   :  { %v334_v58 = vmul.f32 %v2300_v52, %v3022_v15  ;;  %v2336_v5 = vunpack.c.h.bf16 %v2421_v0  ;;  %v2307_v13 = vunpack.c.l.bf16 %v2415_v6 }
  0x56   :  { %2536 = vmatmul.mubr.msk.bf16.gmra.mxu0 %vm536_vm0, %v529_v29  ;;  %v189_v29 = vmul.f32 %v2231_v25, %v2954_v44  ;;  %v3026_v44 = vstv %s1963_s18  ;;  %v2323_v25 = vunpack.c.l.bf16 %v2418_v18  ;;  %v335_v9 = vmul.f32 %v2303_v2, %v3022_v15 }
  0x57   :  { %v394_v21 = vmul.f32 %v2319_v14, %v3026_v44  ;;  %v395_v22 = vmul.f32 %v2320_v16, %v3026_v44  ;;  %v397_v32 = vmul.f32 %v2324_v26, %v3026_v44  ;;  %v398_v50 = vmul.f32 %v2327_v41, %v3026_v44  ;;  %v2423_v26 = vld [vmem:[#allocation10 + $0x70] sm:$0xff]  }
  0x58   :  { %v205_v36 = vadd.f32 %v189_v29, %v122_v27  ;;  %v329_v29 = vmul.f32 %v2291_v23, %v3022_v15  ;;  %v396_v31 = vmul.f32 %v2323_v25, %v3026_v44  ;;  %v399_v51 = vmul.f32 %v2328_v42, %v3026_v44  ;;  %v2416_v25 = vld [vmem:[#allocation10 + $0x30] sm:$0xff]  }
  0x59   :  { %v410_v27 = vadd.f32 %v394_v21, %v327_v38  ;;  %v411_v28 = vadd.f32 %v395_v22, %v328_v20  ;;  %v413_v37 = vadd.f32 %v397_v32, %v330_v30  ;;  %v336_v10 = vmul.f32 %v2304_v3, %v3022_v15  ;;  %v2417_v32 = vld [vmem:[#allocation10 + $0x38] sm:$0xff]  }
  0x5a   :  { %v2268_v45 = vpack.c.bf16 %v206_v39, %v205_v36  ;;  %v412_v36 = vadd.f32 %v396_v31, %v329_v29  ;;  %v2295_v39 = vunpack.c.l.bf16 %v2412_v34  ;;  %v415_v57 = vadd.f32 %v399_v51, %v332_v48 }
  0x5b   :  { %v2352_v33 = vpack.c.bf16 %v411_v28, %v410_v27  ;;  %v402_v11 = vmul.f32 %v2335_v4, %v3026_v44  ;;  %v403_v12 = vmul.f32 %v2336_v5, %v3026_v44  ;;  %v2308_v14 = vunpack.c.h.bf16 %v2415_v6 }
  0x5c   :  { %2407 = vst [vmem:[#allocation2 + $0x20] sm:$0xff] %v2268_v45   ;;  %v2420_v45 = vld [vmem:[#allocation10 + $0x58] sm:$0xff]   ;;  %v2357_v46 = vpack.c.bf16 %v413_v37, %v412_v36  ;;  %v331_v47 = vmul.f32 %v2295_v39, %v3022_v15  ;;  %v2339_v16 = vunpack.c.l.bf16 %v2422_v7  ;;  %v2340_v18 = vunpack.c.h.bf16 %v2422_v7 }
  0x5d   :  { %2425 = vst [vmem:[#allocation2 + $0x40] sm:$0xff] %v2352_v33   ;;  %v2331_v53 = vunpack.c.l.bf16 %v2420_v45  ;;  %v2332_v55 = vunpack.c.h.bf16 %v2420_v45  ;;  %v418_v17 = vadd.f32 %v402_v11, %v335_v9  ;;  %v419_v19 = vadd.f32 %v403_v12, %v336_v10  ;;  %v2424_v33 = vld [vmem:[#allocation10 + $0x78] sm:$0xff]  }
  0x5e   :  { %2426 = vst [vmem:[#allocation2 + $0x48] sm:$0xff] %v2357_v46   ;;  %v414_v56 = vadd.f32 %v398_v50, %v331_v47  ;;  %v337_v38 = vmul.f32 %v2307_v13, %v3022_v15  ;;  %v338_v20 = vmul.f32 %v2308_v14, %v3022_v15  ;;  %v404_v21 = vmul.f32 %v2339_v16, %v3026_v44  ;;  %v2698_v13 = vld [vmem:[#allocation2 + $0x8] sm:$0xff]   ;;  %v2699_v14 = vld [vmem:[#allocation2 + $0x10] sm:$0xff]   ;;  %v2700_v16 = vld [vmem:[#allocation2 + $0x18] sm:$0xff]  }
  0x5f   :  { %v400_v59 = vmul.f32 %v2331_v53, %v3026_v44  ;;  %v401_v60 = vmul.f32 %v2332_v55, %v3026_v44  ;;  %v405_v22 = vmul.f32 %v2340_v18, %v3026_v44  ;;  %v2372_v23 = vpack.c.bf16 %v419_v19, %v418_v17  ;;  %v2702_v18 = vld [vmem:[#allocation2 + $0x28] sm:$0xff]   ;;  %v2703_v19 = vld [vmem:[#allocation2 + $0x30] sm:$0xff]  }
  0x60   :  { %v2362_v61 = vpack.c.bf16 %v415_v57, %v414_v56  ;;  %v420_v24 = vadd.f32 %v404_v21, %v337_v38  ;;  %v2311_v28 = vunpack.c.l.bf16 %v2416_v25  ;;  %v2312_v29 = vunpack.c.h.bf16 %v2416_v25  ;;  %v2704_v38 = vld [vmem:[#allocation2 + $0x38] sm:$0xff]  }
  0x61   :  { %v416_v62 = vadd.f32 %v400_v59, %v333_v54  ;;  %v417_v1 = vadd.f32 %v401_v60, %v334_v58  ;;  %v421_v27 = vadd.f32 %v405_v22, %v338_v20  ;;  %v2343_v30 = vunpack.c.l.bf16 %v2423_v26  ;;  %2429 = vst [vmem:[#allocation2 + $0x60] sm:$0xff] %v2372_v23  }
  0x62   :  { %2427 = vst [vmem:[#allocation2 + $0x50] sm:$0xff] %v2362_v61   ;;  %v2344_v31 = vunpack.c.h.bf16 %v2423_v26  ;;  %v339_v35 = vmul.f32 %v2311_v28, %v3022_v15  ;;  %v340_v36 = vmul.f32 %v2312_v29, %v3022_v15  ;;  %v2315_v40 = vunpack.c.l.bf16 %v2417_v32  ;;  %v1154_v28 = vld [vmem:[%s3407_s7 + $0x30] sm:$0xff]  ;;  %v1155_v29 = vld [vmem:[%s3407_s7 + $0x38] sm:$0xff] }
  0x63   :  { %v2367_v8 = vpack.c.bf16 %v417_v1, %v416_v62  ;;  %v2377_v34 = vpack.c.bf16 %v421_v27, %v420_v24  ;;  %v406_v37 = vmul.f32 %v2343_v30, %v3026_v44  ;;  %v2316_v41 = vunpack.c.h.bf16 %v2417_v32  ;;  %v2701_v17 = vld [vmem:[#allocation2 + $0x20] sm:$0xff]   ;;  %v1153_v32 = vld [vmem:[%s3407_s7 + $0x28] sm:$0xff] }
  0x64   :  { %v407_v39 = vmul.f32 %v2344_v31, %v3026_v44  ;;  %v2347_v42 = vunpack.c.l.bf16 %v2424_v33  ;;  %v2348_v45 = vunpack.c.h.bf16 %v2424_v33  ;;  %v341_v47 = vmul.f32 %v2315_v40, %v3022_v15  ;;  %v2705_v20 = vld [vmem:[#allocation2 + $0x40] sm:$0xff]  }
  0x65   :  { %2428 = vst [vmem:[#allocation2 + $0x58] sm:$0xff] %v2367_v8   ;;  %2430 = vst [vmem:[#allocation2 + $0x68] sm:$0xff] %v2377_v34   ;;  %v422_v43 = vadd.f32 %v406_v37, %v339_v35  ;;  %v342_v48 = vmul.f32 %v2316_v41, %v3022_v15  ;;  %v2706_v21 = vld [vmem:[#allocation2 + $0x48] sm:$0xff]   ;;  %v1159_v30 = vpack.c.bf16 %v1155_v29, %v1154_v28  ;;  %v1152_v31 = vld [vmem:[%s3407_s7 + $0x20] sm:$0xff] }
  0x66   :  { %v423_v46 = vadd.f32 %v407_v39, %v340_v36  ;;  %v408_v49 = vmul.f32 %v2347_v42, %v3026_v44  ;;  %v409_v50 = vmul.f32 %v2348_v45, %v3026_v44  ;;  %v1158_v33 = vpack.c.bf16 %v1153_v32, %v1152_v31  ;;  %v1150_v34 = vld [vmem:[%s3407_s7 + $0x10] sm:$0xff]  ;;  %v1151_v35 = vld [vmem:[%s3407_s7 + $0x18] sm:$0xff]  ;;  %v1148_v37 = vld [vmem:[%s3407_s7] sm:$0xff] }
  0x67   :  { %2587 = vmatprep.subr.bf16.mxu0 %v1159_v30  ;;  %v1157_v36 = vpack.c.bf16 %v1151_v35, %v1150_v34  ;;  %v1149_v39 = vld [vmem:[%s3407_s7 + $0x8] sm:$0xff] }
  0x68   :  { %v2382_v51 = vpack.c.bf16 %v423_v46, %v422_v43  ;;  %v424_v52 = vadd.f32 %v408_v49, %v341_v47  ;;  %v425_v53 = vadd.f32 %v409_v50, %v342_v48  ;;  %v2709_v24 = vld [vmem:[#allocation2 + $0x60] sm:$0xff]   ;;  %2588 = vmatpush3.bf16.msra.mxu0 %v1159_v30  ;;  %v1156_v40 = vpack.c.bf16 %v1149_v39, %v1148_v37 }
  0x69   :  { %v2707_v22 = vld [vmem:[#allocation2 + $0x50] sm:$0xff]   ;;  %2589 = vmatprep.subr.bf16.mxu0 %v1158_v33 }
  0x6a   :  { %2431 = vst [vmem:[#allocation2 + $0x70] sm:$0xff] %v2382_v51   ;;  %v2387_v54 = vpack.c.bf16 %v425_v53, %v424_v52 }
  0x6c   :  { %2432 = vst [vmem:[#allocation2 + $0x78] sm:$0xff] %v2387_v54   ;;  %v2708_v23 = vld [vmem:[#allocation2 + $0x58] sm:$0xff]   ;;  %v2710_v25 = vld [vmem:[#allocation2 + $0x68] sm:$0xff]   ;;  %2590 = vmatpush3.bf16.msra.mxu0 %v1158_v33 }
  0x6d   :  { %2591 = vmatprep.subr.bf16.mxu0 %v1157_v36 }
  0x70   :  { %2592 = vmatpush3.bf16.msra.mxu0 %v1157_v36 }
  0x71   :  { %v2711_v26 = vld [vmem:[#allocation2 + $0x70] sm:$0xff]   ;;  %2593 = vmatprep.subr.bf16.mxu0 %v1156_v40 }
  0x73   :  { %v2712_v27 = vld [vmem:[#allocation2 + $0x78] sm:$0xff]  }
  0x74   :  { %2594 = vmatpush3.bf16.msra.mxu0 %v1156_v40 }
  0xfe   :  { %v2525_v55 = vpop.f32.mrf.mxu0 }
 0x100   :  { %v595_v56 = vpop.f32.mrf.mxu0 }
 0x102   :  { %v2526_v57 = vpop.f32.mrf.mxu0 }
 0x103   :  { %v659_v11 = vpack.c.bf16 %v2526_v57, %v2525_v55 }
 0x104   :  { %v598_v58 = vpop.f32.mrf.mxu0 }
 0x105   :  { %v658_v12 = vpack.c.bf16 %v598_v58, %v595_v56 }
 0x106   :  { %v2529_v59 = vpop.f32.mrf.mxu0 }
 0x108   :  { %v611_v60 = vpop.f32.mrf.mxu0 }
 0x10a   :  { %v2530_v61 = vpop.f32.mrf.mxu0 }
 0x10b   :  { %v661_v9 = vpack.c.bf16 %v2530_v61, %v2529_v59 }
 0x10c   :  { %v614_v62 = vpop.f32.mrf.mxu0 }
 0x10d   :  { %v660_v10 = vpack.c.bf16 %v614_v62, %v611_v60 }
 0x10e   :  { %v2533_v63 = vpop.f32.mrf.mxu0 }
 0x110   :  { %v627_v15 = vpop.f32.mrf.mxu0 }
 0x112   :  { %v2534_v0 = vpop.f32.mrf.mxu0 }
 0x113   :  { %v663_v7 = vpack.c.bf16 %v2534_v0, %v2533_v63 }
 0x114   :  { %v630_v1 = vpop.f32.mrf.mxu0 }
 0x115   :  { %v662_v8 = vpack.c.bf16 %v630_v1, %v627_v15 }
 0x116   :  { %v2537_v2 = vpop.f32.mrf.mxu0 }
 0x118   :  { %v643_v44 = vpop.f32.mrf.mxu0 }
 0x11a   :  { %v2538_v3 = vpop.f32.mrf.mxu0 }
 0x11b   :  { %v665_v4 = vpack.c.bf16 %v2538_v3, %v2537_v2 }
 0x11c   :  { %v646_v5 = vpop.f32.mrf.mxu0 }
 0x11d   :  { %v664_v6 = vpack.c.bf16 %v646_v5, %v643_v44  ;;  %2539 = vmatprep.subr.bf16.mxu1 %v665_v4 }
 0x11e   :  { %2540 = vmatpush3.bf16.msra.mxu1 %v665_v4 }
 0x11f   :  { %2541 = vmatprep.subr.bf16.mxu1 %v664_v6 }
 0x122   :  { %2542 = vmatpush3.bf16.msra.mxu1 %v664_v6 }
 0x123   :  { %2543 = vmatprep.subr.bf16.mxu1 %v663_v7 }
 0x126   :  { %2544 = vmatpush3.bf16.msra.mxu1 %v663_v7 }
 0x127   :  { %2545 = vmatprep.subr.bf16.mxu1 %v662_v8 }
 0x12a   :  { %2546 = vmatpush3.bf16.msra.mxu1 %v662_v8 }
 0x12b   :  { %2547 = vmatprep.subr.bf16.mxu1 %v661_v9 }
 0x12e   :  { %2548 = vmatpush3.bf16.msra.mxu1 %v661_v9 }
 0x12f   :  { %2549 = vmatprep.subr.bf16.mxu1 %v660_v10 }
 0x132   :  { %2550 = vmatpush3.bf16.msra.mxu1 %v660_v10 }
 0x133   :  { %2551 = vmatprep.subr.bf16.mxu1 %v659_v11 }
 0x136   :  { %2552 = vmatpush3.bf16.msra.mxu1 %v659_v11 }
 0x137   :  { %2553 = vmatprep.subr.bf16.mxu1 %v658_v12 }
 0x13a   :  { %2554 = vmatpush3.bf16.msra.mxu1 %v658_v12 }
 0x13d   :  { %2556 = vmatmul.mubr.bf16.vlgmr.msra.gmra.mxu1 %v2698_v13 }
 0x13e   :  { %2559 = vmatprep.mubr.bf16.mxu1 %v2699_v14 }
 0x145   :  { %2560 = vmatmul.mubr.bf16.gmra.mxu1 %v2700_v16 }
 0x146   :  { %2563 = vmatprep.mubr.bf16.mxu1 %v2701_v17 }
 0x14d   :  { %2564 = vmatmul.mubr.bf16.gmra.mxu1 %v2702_v18 }
 0x14e   :  { %2567 = vmatprep.mubr.bf16.mxu1 %v2703_v19 }
 0x155   :  { %2568 = vmatmul.mubr.bf16.gmra.mxu1 %v2704_v38 }
 0x156   :  { %2571 = vmatprep.mubr.bf16.mxu1 %v2705_v20 }
 0x15d   :  { %2572 = vmatmul.mubr.bf16.gmra.mxu1 %v2706_v21 }
 0x15e   :  { %2575 = vmatprep.mubr.bf16.mxu1 %v2707_v22 }
 0x165   :  { %2576 = vmatmul.mubr.bf16.gmra.mxu1 %v2708_v23 }
 0x166   :  { %2579 = vmatprep.mubr.bf16.mxu1 %v2709_v24 }
 0x16d   :  { %2580 = vmatmul.mubr.bf16.gmra.mxu1 %v2710_v25 }
 0x16e   :  { %2583 = vmatprep.mubr.bf16.mxu1 %v2711_v26 }
 0x175   :  { %2584 = vmatmul.mubr.bf16.gmra.mxu1 %v2712_v27 }
 0x1fd   :  { %v2557_v41 = vpop.f32.mrf.mxu1 }
 0x1fe   :  { %v957_v42 = vmax.f32 %v2557_v41, 0.0 }
 0x1ff   :  { %v828_v43 = vpop.f32.mrf.mxu1 }
 0x200   :  { %v2151_v45 = vpack.c.bf16 %v957_v42, %v957_v42  ;;  %v955_v46 = vmax.f32 %v828_v43, 0.0 }
 0x201   :  { %v2558_v47 = vpop.f32.mrf.mxu1 }
 0x202   :  { %1118 = vst.msk [vmem:[#allocation3 + $0x8] sm:$0xf] %vm1115_vm1, %v2151_v45  ;;  %v2149_v48 = vpack.c.bf16 %v955_v46, %v955_v46  ;;  %v958_v49 = vmax.f32 %v2558_v47, 0.0 }
 0x203   :  { %v831_v50 = vpop.f32.mrf.mxu1 }
 0x204   :  { %1116 = vst.msk [vmem:[#allocation3] sm:$0xf] %vm1115_vm1, %v2149_v48  ;;  %v2152_v51 = vpack.c.bf16 %v958_v49, %v958_v49  ;;  %v956_v52 = vmax.f32 %v831_v50, 0.0 }
 0x205   :  { %v2561_v53 = vpop.f32.mrf.mxu1 }
 0x206   :  { %1119 = vst.msk [vmem:[#allocation3 + $0xc] sm:$0xf] %vm1115_vm1, %v2152_v51  ;;  %v2150_v54 = vpack.c.bf16 %v956_v52, %v956_v52  ;;  %v961_v55 = vmax.f32 %v2561_v53, 0.0 }
 0x207   :  { %v844_v56 = vpop.f32.mrf.mxu1 }
 0x208   :  { %1117 = vst.msk [vmem:[#allocation3 + $0x4] sm:$0xf] %vm1115_vm1, %v2150_v54  ;;  %v2155_v57 = vpack.c.bf16 %v961_v55, %v961_v55  ;;  %v959_v58 = vmax.f32 %v844_v56, 0.0 }
 0x209   :  { %v2562_v59 = vpop.f32.mrf.mxu1 }
 0x20a   :  { %1122 = vst.msk [vmem:[#allocation3 + $0x18] sm:$0xf] %vm1115_vm1, %v2155_v57  ;;  %v2153_v60 = vpack.c.bf16 %v959_v58, %v959_v58  ;;  %v962_v61 = vmax.f32 %v2562_v59, 0.0 }
 0x20b   :  { %v847_v62 = vpop.f32.mrf.mxu1 }
 0x20c   :  { %1120 = vst.msk [vmem:[#allocation3 + $0x10] sm:$0xf] %vm1115_vm1, %v2153_v60  ;;  %v2156_v63 = vpack.c.bf16 %v962_v61, %v962_v61  ;;  %v960_v15 = vmax.f32 %v847_v62, 0.0 }
 0x20d   :  { %v2565_v0 = vpop.f32.mrf.mxu1  ;;  %v2714_v6 = vld [vmem:[#allocation3 + $0x8] sm:$0xff]  }
 0x20e   :  { %1123 = vst.msk [vmem:[#allocation3 + $0x1c] sm:$0xf] %vm1115_vm1, %v2156_v63  ;;  %v2154_v1 = vpack.c.bf16 %v960_v15, %v960_v15  ;;  %v965_v2 = vmax.f32 %v2565_v0, 0.0 }
 0x20f   :  { %v860_v44 = vpop.f32.mrf.mxu1  ;;  %v2713_v3 = vld [vmem:[#allocation3] sm:$0xff]  }
 0x210   :  { %1121 = vst.msk [vmem:[#allocation3 + $0x14] sm:$0xf] %vm1115_vm1, %v2154_v1  ;;  %v2159_v4 = vpack.c.bf16 %v965_v2, %v965_v2  ;;  %v963_v5 = vmax.f32 %v860_v44, 0.0  ;;  %2595 = vmatprep.mubr.msk.bf16.mxu0 %vm1272_vm2, %v2713_v3 }
 0x211   :  { %v2566_v7 = vpop.f32.mrf.mxu1  ;;  %2596 = vmatmul.mubr.msk.bf16.vlgmr.msra.gmra.mxu0 %vm1272_vm2, %v2714_v6 }
 0x212   :  { %1126 = vst.msk [vmem:[#allocation3 + $0x28] sm:$0xf] %vm1115_vm1, %v2159_v4  ;;  %v2157_v8 = vpack.c.bf16 %v963_v5, %v963_v5  ;;  %v966_v9 = vmax.f32 %v2566_v7, 0.0 }
 0x213   :  { %v863_v10 = vpop.f32.mrf.mxu1 }
 0x214   :  { %1124 = vst.msk [vmem:[#allocation3 + $0x20] sm:$0xf] %vm1115_vm1, %v2157_v8  ;;  %v2160_v11 = vpack.c.bf16 %v966_v9, %v966_v9  ;;  %v964_v12 = vmax.f32 %v863_v10, 0.0 }
 0x215   :  { %v2569_v13 = vpop.f32.mrf.mxu1  ;;  %v2716_v20 = vld [vmem:[#allocation3 + $0x18] sm:$0xff]  }
 0x216   :  { %1127 = vst.msk [vmem:[#allocation3 + $0x2c] sm:$0xf] %vm1115_vm1, %v2160_v11  ;;  %v2158_v14 = vpack.c.bf16 %v964_v12, %v964_v12  ;;  %v969_v16 = vmax.f32 %v2569_v13, 0.0 }
 0x217   :  { %v876_v17 = vpop.f32.mrf.mxu1  ;;  %v2715_v18 = vld [vmem:[#allocation3 + $0x10] sm:$0xff]  }
 0x218   :  { %1125 = vst.msk [vmem:[#allocation3 + $0x24] sm:$0xf] %vm1115_vm1, %v2158_v14  ;;  %v2163_v19 = vpack.c.bf16 %v969_v16, %v969_v16  ;;  %v967_v38 = vmax.f32 %v876_v17, 0.0  ;;  %2599 = vmatprep.mubr.msk.bf16.mxu0 %vm1272_vm2, %v2715_v18 }
 0x219   :  { %v2570_v21 = vpop.f32.mrf.mxu1  ;;  %2600 = vmatmul.mubr.msk.bf16.gmra.mxu0 %vm1272_vm2, %v2716_v20 }
 0x21a   :  { %1130 = vst.msk [vmem:[#allocation3 + $0x38] sm:$0xf] %vm1115_vm1, %v2163_v19  ;;  %v2161_v22 = vpack.c.bf16 %v967_v38, %v967_v38  ;;  %v970_v23 = vmax.f32 %v2570_v21, 0.0 }
 0x21b   :  { %v879_v24 = vpop.f32.mrf.mxu1 }
 0x21c   :  { %1128 = vst.msk [vmem:[#allocation3 + $0x30] sm:$0xf] %vm1115_vm1, %v2161_v22  ;;  %v2164_v25 = vpack.c.bf16 %v970_v23, %v970_v23  ;;  %v968_v26 = vmax.f32 %v879_v24, 0.0  ;;  %v2729_v24 = vld [vmem:[#allocation2] sm:$0xff]  }
 0x21d   :  { %v2573_v27 = vpop.f32.mrf.mxu1  ;;  %v2718_v34 = vld [vmem:[#allocation3 + $0x28] sm:$0xff]   ;;  %2643 = vmatprep.mubr.bf16.mxu1 %v2729_v24 }
 0x21e   :  { %1131 = vst.msk [vmem:[#allocation3 + $0x3c] sm:$0xf] %vm1115_vm1, %v2164_v25  ;;  %v2162_v28 = vpack.c.bf16 %v968_v26, %v968_v26  ;;  %v973_v29 = vmax.f32 %v2573_v27, 0.0  ;;  %v2730_v25 = vld [vmem:[#allocation2 + $0x40] sm:$0xff]  }
 0x21f   :  { %v892_v30 = vpop.f32.mrf.mxu1  ;;  %v2717_v31 = vld [vmem:[#allocation3 + $0x20] sm:$0xff]  }
 0x220   :  { %1129 = vst.msk [vmem:[#allocation3 + $0x34] sm:$0xf] %vm1115_vm1, %v2162_v28  ;;  %v2167_v32 = vpack.c.bf16 %v973_v29, %v973_v29  ;;  %v971_v33 = vmax.f32 %v892_v30, 0.0  ;;  %2603 = vmatprep.mubr.msk.bf16.mxu0 %vm1272_vm2, %v2717_v31 }
 0x221   :  { %v2574_v35 = vpop.f32.mrf.mxu1  ;;  %2604 = vmatmul.mubr.msk.bf16.gmra.mxu0 %vm1272_vm2, %v2718_v34 }
 0x222   :  { %1134 = vst.msk [vmem:[#allocation3 + $0x48] sm:$0xf] %vm1115_vm1, %v2167_v32  ;;  %v2165_v36 = vpack.c.bf16 %v971_v33, %v971_v33  ;;  %v974_v37 = vmax.f32 %v2574_v35, 0.0 }
 0x223   :  { %v895_v39 = vpop.f32.mrf.mxu1 }
 0x224   :  { %1132 = vst.msk [vmem:[#allocation3 + $0x40] sm:$0xf] %vm1115_vm1, %v2165_v36  ;;  %v2168_v40 = vpack.c.bf16 %v974_v37, %v974_v37  ;;  %v972_v41 = vmax.f32 %v895_v39, 0.0 }
 0x225   :  { %v2577_v42 = vpop.f32.mrf.mxu1  ;;  %v2720_v50 = vld [vmem:[#allocation3 + $0x38] sm:$0xff]  }
 0x226   :  { %1135 = vst.msk [vmem:[#allocation3 + $0x4c] sm:$0xf] %vm1115_vm1, %v2168_v40  ;;  %v2166_v43 = vpack.c.bf16 %v972_v41, %v972_v41  ;;  %v977_v45 = vmax.f32 %v2577_v42, 0.0 }
 0x227   :  { %v908_v46 = vpop.f32.mrf.mxu1  ;;  %v2719_v47 = vld [vmem:[#allocation3 + $0x30] sm:$0xff]  }
 0x228   :  { %1133 = vst.msk [vmem:[#allocation3 + $0x44] sm:$0xf] %vm1115_vm1, %v2166_v43  ;;  %v2171_v48 = vpack.c.bf16 %v977_v45, %v977_v45  ;;  %v975_v49 = vmax.f32 %v908_v46, 0.0  ;;  %2607 = vmatprep.mubr.msk.bf16.mxu0 %vm1272_vm2, %v2719_v47 }
 0x229   :  { %v2578_v51 = vpop.f32.mrf.mxu1  ;;  %2608 = vmatmul.mubr.msk.bf16.gmra.mxu0 %vm1272_vm2, %v2720_v50 }
 0x22a   :  { %1138 = vst.msk [vmem:[#allocation3 + $0x58] sm:$0xf] %vm1115_vm1, %v2171_v48  ;;  %v2169_v52 = vpack.c.bf16 %v975_v49, %v975_v49  ;;  %v978_v53 = vmax.f32 %v2578_v51, 0.0 }
 0x22b   :  { %v911_v54 = vpop.f32.mrf.mxu1 }
 0x22c   :  { %1136 = vst.msk [vmem:[#allocation3 + $0x50] sm:$0xf] %vm1115_vm1, %v2169_v52  ;;  %v2172_v55 = vpack.c.bf16 %v978_v53, %v978_v53  ;;  %v976_v56 = vmax.f32 %v911_v54, 0.0 }
 0x22d   :  { %v2581_v57 = vpop.f32.mrf.mxu1  ;;  %v2722_v15 = vld [vmem:[#allocation3 + $0x48] sm:$0xff]  }
 0x22e   :  { %1139 = vst.msk [vmem:[#allocation3 + $0x5c] sm:$0xf] %vm1115_vm1, %v2172_v55  ;;  %v2170_v58 = vpack.c.bf16 %v976_v56, %v976_v56  ;;  %v981_v59 = vmax.f32 %v2581_v57, 0.0 }
 0x22f   :  { %v924_v60 = vpop.f32.mrf.mxu1  ;;  %v2721_v61 = vld [vmem:[#allocation3 + $0x40] sm:$0xff]  }
 0x230   :  { %1137 = vst.msk [vmem:[#allocation3 + $0x54] sm:$0xf] %vm1115_vm1, %v2170_v58  ;;  %v2175_v62 = vpack.c.bf16 %v981_v59, %v981_v59  ;;  %v979_v63 = vmax.f32 %v924_v60, 0.0  ;;  %2611 = vmatprep.mubr.msk.bf16.mxu0 %vm1272_vm2, %v2721_v61 }
 0x231   :  { %v2582_v0 = vpop.f32.mrf.mxu1  ;;  %2612 = vmatmul.mubr.msk.bf16.gmra.mxu0 %vm1272_vm2, %v2722_v15 }
 0x232   :  { %1142 = vst.msk [vmem:[#allocation3 + $0x68] sm:$0xf] %vm1115_vm1, %v2175_v62  ;;  %v2173_v1 = vpack.c.bf16 %v979_v63, %v979_v63  ;;  %v982_v2 = vmax.f32 %v2582_v0, 0.0 }
 0x233   :  { %v927_v44 = vpop.f32.mrf.mxu1 }
 0x234   :  { %1140 = vst.msk [vmem:[#allocation3 + $0x60] sm:$0xf] %vm1115_vm1, %v2173_v1  ;;  %v2176_v3 = vpack.c.bf16 %v982_v2, %v982_v2  ;;  %v980_v4 = vmax.f32 %v927_v44, 0.0  ;;  %v2731_v1 = vld [vmem:[#allocation2 + $0x8] sm:$0xff]   ;;  %v2733_v44 = vld [vmem:[#allocation2 + $0x10] sm:$0xff]  }
 0x235   :  { %v2585_v5 = vpop.f32.mrf.mxu1  ;;  %v2724_v12 = vld [vmem:[#allocation3 + $0x58] sm:$0xff]  }
 0x236   :  { %1143 = vst.msk [vmem:[#allocation3 + $0x6c] sm:$0xf] %vm1115_vm1, %v2176_v3  ;;  %v2174_v6 = vpack.c.bf16 %v980_v4, %v980_v4  ;;  %v985_v7 = vmax.f32 %v2585_v5, 0.0 }
 0x237   :  { %v940_v8 = vpop.f32.mrf.mxu1  ;;  %v2723_v9 = vld [vmem:[#allocation3 + $0x50] sm:$0xff]  }
 0x238   :  { %1141 = vst.msk [vmem:[#allocation3 + $0x64] sm:$0xf] %vm1115_vm1, %v2174_v6  ;;  %v2179_v10 = vpack.c.bf16 %v985_v7, %v985_v7  ;;  %v983_v11 = vmax.f32 %v940_v8, 0.0  ;;  %2615 = vmatprep.mubr.msk.bf16.mxu0 %vm1272_vm2, %v2723_v9  ;;  %v2735_v7 = vld [vmem:[#allocation2 + $0x18] sm:$0xff]   ;;  %v2737_v8 = vld [vmem:[#allocation2 + $0x20] sm:$0xff]  }
 0x239   :  { %v2586_v13 = vpop.f32.mrf.mxu1  ;;  %2616 = vmatmul.mubr.msk.bf16.gmra.mxu0 %vm1272_vm2, %v2724_v12  ;;  %v2741_v12 = vld [vmem:[#allocation2 + $0x30] sm:$0xff]  }
 0x23a   :  { %1146 = vst.msk [vmem:[#allocation3 + $0x78] sm:$0xf] %vm1115_vm1, %v2179_v10  ;;  %v2177_v14 = vpack.c.bf16 %v983_v11, %v983_v11  ;;  %v986_v16 = vmax.f32 %v2586_v13, 0.0  ;;  %v2739_v11 = vld [vmem:[#allocation2 + $0x28] sm:$0xff]  }
 0x23b   :  { %v943_v17 = vpop.f32.mrf.mxu1 }
 0x23c   :  { %1144 = vst.msk [vmem:[#allocation3 + $0x70] sm:$0xf] %vm1115_vm1, %v2177_v14  ;;  %v2180_v18 = vpack.c.bf16 %v986_v16, %v986_v16  ;;  %v984_v19 = vmax.f32 %v943_v17, 0.0  ;;  %v2743_v16 = vld [vmem:[#allocation2 + $0x38] sm:$0xff]  }
 0x23d   :  { %v2726_v21 = vld [vmem:[#allocation3 + $0x68] sm:$0xff]  }
 0x23e   :  { %1147 = vst.msk [vmem:[#allocation3 + $0x7c] sm:$0xf] %vm1115_vm1, %v2180_v18  ;;  %v2178_v38 = vpack.c.bf16 %v984_v19, %v984_v19  ;;  %v2732_v18 = vld [vmem:[#allocation2 + $0x48] sm:$0xff]   ;;  %v2734_v19 = vld [vmem:[#allocation2 + $0x50] sm:$0xff]  }
 0x23f   :  { %v2725_v20 = vld [vmem:[#allocation3 + $0x60] sm:$0xff]  }
 0x240   :  { %1145 = vst.msk [vmem:[#allocation3 + $0x74] sm:$0xf] %vm1115_vm1, %v2178_v38  ;;  %2619 = vmatprep.mubr.msk.bf16.mxu0 %vm1272_vm2, %v2725_v20  ;;  %v2736_v38 = vld [vmem:[#allocation2 + $0x58] sm:$0xff]   ;;  %v2738_v20 = vld [vmem:[#allocation2 + $0x60] sm:$0xff]  }
 0x241   :  { %2620 = vmatmul.mubr.msk.bf16.gmra.mxu0 %vm1272_vm2, %v2726_v21  ;;  %v2740_v21 = vld [vmem:[#allocation2 + $0x68] sm:$0xff]  }
 0x245   :  { %v2728_v23 = vld [vmem:[#allocation3 + $0x78] sm:$0xff]  }
 0x247   :  { %v2727_v22 = vld [vmem:[#allocation3 + $0x70] sm:$0xff]  }
 0x248   :  { %2623 = vmatprep.mubr.msk.bf16.mxu0 %vm1272_vm2, %v2727_v22  ;;  %v2742_v22 = vld [vmem:[#allocation2 + $0x70] sm:$0xff]  }
 0x249   :  { %2624 = vmatmul.mubr.msk.bf16.gmra.mxu0 %vm1272_vm2, %v2728_v23  ;;  %v2744_v23 = vld [vmem:[#allocation2 + $0x78] sm:$0xff]  }
 0x24a   :  { %2675 = vmatprep.mubr.bf16.mxu0 %v2730_v25 }
 0x2d1   :  { %v2597_v26 = vpop.f32.mrf.mxu0 }
 0x2d3   :  { %v1355_v27 = vpop.f32.mrf.mxu0 }
 0x2d5   :  { %v2598_v28 = vpop.f32.mrf.mxu0 }
 0x2d6   :  { %v1483_v60 = vpack.c.bf16 %v2598_v28, %v2597_v26 }
 0x2d7   :  { %v1358_v29 = vpop.f32.mrf.mxu0 }
 0x2d8   :  { %v1482_v63 = vpack.c.bf16 %v1358_v29, %v1355_v27 }
 0x2d9   :  { %v2601_v30 = vpop.f32.mrf.mxu0 }
 0x2db   :  { %v1371_v31 = vpop.f32.mrf.mxu0 }
 0x2dd   :  { %v2602_v32 = vpop.f32.mrf.mxu0 }
 0x2de   :  { %v1485_v54 = vpack.c.bf16 %v2602_v32, %v2601_v30 }
 0x2df   :  { %v1374_v33 = vpop.f32.mrf.mxu0 }
 0x2e0   :  { %v1484_v57 = vpack.c.bf16 %v1374_v33, %v1371_v31 }
 0x2e1   :  { %v2605_v34 = vpop.f32.mrf.mxu0 }
 0x2e3   :  { %v1387_v35 = vpop.f32.mrf.mxu0 }
 0x2e5   :  { %v2606_v36 = vpop.f32.mrf.mxu0 }
 0x2e6   :  { %v1487_v48 = vpack.c.bf16 %v2606_v36, %v2605_v34 }
 0x2e7   :  { %v1390_v37 = vpop.f32.mrf.mxu0 }
 0x2e8   :  { %v1486_v51 = vpack.c.bf16 %v1390_v37, %v1387_v35 }
 0x2e9   :  { %v2609_v39 = vpop.f32.mrf.mxu0 }
 0x2eb   :  { %v1403_v40 = vpop.f32.mrf.mxu0 }
 0x2ed   :  { %v2610_v41 = vpop.f32.mrf.mxu0 }
 0x2ee   :  { %v1489_v42 = vpack.c.bf16 %v2610_v41, %v2609_v39  ;;  %v3213_v39 = vstv %s1820_s22  ;;  %v3222_v41 = vstv %s2084_s25 }
 0x2ef   :  { %v1406_v43 = vpop.f32.mrf.mxu0 }
 0x2f0   :  { %v1488_v45 = vpack.c.bf16 %v1406_v43, %v1403_v40  ;;  %2627 = vmatprep.subr.bf16.mxu1 %v1489_v42 }
 0x2f1   :  { %v3130_v46 = vpop.f32.mrf.mxu0  ;;  %2628 = vmatpush3.bf16.msra.mxu1 %v1489_v42 }
 0x2f2   :  { %2629 = vmatprep.subr.bf16.mxu1 %v1488_v45 }
 0x2f3   :  { %v3132_v47 = vpop.f32.mrf.mxu0 }
 0x2f5   :  { %v2614_v49 = vpop.f32.mrf.mxu0  ;;  %2630 = vmatpush3.bf16.msra.mxu1 %v1488_v45 }
 0x2f6   :  { %2631 = vmatprep.subr.bf16.mxu1 %v1487_v48  ;;  %v1491_v14 = vpack.c.bf16 %v2614_v49, %v3130_v46 }
 0x2f7   :  { %v1422_v50 = vpop.f32.mrf.mxu0 }
 0x2f8   :  { %v1490_v17 = vpack.c.bf16 %v1422_v50, %v3132_v47 }
 0x2f9   :  { %v2617_v52 = vpop.f32.mrf.mxu0  ;;  %2632 = vmatpush3.bf16.msra.mxu1 %v1487_v48 }
 0x2fa   :  { %2633 = vmatprep.subr.bf16.mxu1 %v1486_v51 }
 0x2fb   :  { %v1435_v53 = vpop.f32.mrf.mxu0 }
 0x2fd   :  { %v2618_v55 = vpop.f32.mrf.mxu0  ;;  %2634 = vmatpush3.bf16.msra.mxu1 %v1486_v51 }
 0x2fe   :  { %2635 = vmatprep.subr.bf16.mxu1 %v1485_v54  ;;  %v1493_v10 = vpack.c.bf16 %v2618_v55, %v2617_v52 }
 0x2ff   :  { %v1438_v56 = vpop.f32.mrf.mxu0 }
 0x300   :  { %v1492_v13 = vpack.c.bf16 %v1438_v56, %v1435_v53 }
 0x301   :  { %v2621_v58 = vpop.f32.mrf.mxu0  ;;  %2636 = vmatpush3.bf16.msra.mxu1 %v1485_v54 }
 0x302   :  { %2637 = vmatprep.subr.bf16.mxu1 %v1484_v57 }
 0x303   :  { %v1451_v59 = vpop.f32.mrf.mxu0 }
 0x305   :  { %v2622_v61 = vpop.f32.mrf.mxu0  ;;  %2638 = vmatpush3.bf16.msra.mxu1 %v1484_v57 }
 0x306   :  { %2639 = vmatprep.subr.bf16.mxu1 %v1483_v60  ;;  %v1495_v6 = vpack.c.bf16 %v2622_v61, %v2621_v58 }
 0x307   :  { %v1454_v62 = vpop.f32.mrf.mxu0 }
 0x308   :  { %v1494_v9 = vpack.c.bf16 %v1454_v62, %v1451_v59 }
 0x309   :  { %v2625_v15 = vpop.f32.mrf.mxu0  ;;  %2640 = vmatpush3.bf16.msra.mxu1 %v1483_v60 }
 0x30a   :  { %2641 = vmatprep.subr.bf16.mxu1 %v1482_v63 }
 0x30b   :  { %v1467_v0 = vpop.f32.mrf.mxu0 }
 0x30d   :  { %v2626_v2 = vpop.f32.mrf.mxu0  ;;  %2642 = vmatpush3.bf16.msra.mxu1 %v1482_v63 }
 0x30e   :  { %v1497_v3 = vpack.c.bf16 %v2626_v2, %v2625_v15 }
 0x30f   :  { %v1470_v4 = vpop.f32.mrf.mxu0 }
 0x310   :  { %v1496_v5 = vpack.c.bf16 %v1470_v4, %v1467_v0  ;;  %2659 = vmatprep.subr.bf16.mxu0 %v1497_v3  ;;  %2644 = vmatmul.mubr.bf16.vlgmr.msra.gmra.mxu1 %v2731_v1 }
 0x311   :  { %2660 = vmatpush3.bf16.msra.mxu0 %v1497_v3  ;;  %2647 = vmatprep.mubr.bf16.mxu1 %v2733_v44 }
 0x312   :  { %2661 = vmatprep.subr.bf16.mxu0 %v1496_v5 }
 0x315   :  { %2662 = vmatpush3.bf16.msra.mxu0 %v1496_v5 }
 0x316   :  { %2663 = vmatprep.subr.bf16.mxu0 %v1495_v6 }
 0x318   :  { %2648 = vmatmul.mubr.bf16.gmra.mxu1 %v2735_v7 }
 0x319   :  { %2664 = vmatpush3.bf16.msra.mxu0 %v1495_v6  ;;  %2651 = vmatprep.mubr.bf16.mxu1 %v2737_v8 }
 0x31a   :  { %2665 = vmatprep.subr.bf16.mxu0 %v1494_v9 }
 0x31d   :  { %2666 = vmatpush3.bf16.msra.mxu0 %v1494_v9 }
 0x31e   :  { %2667 = vmatprep.subr.bf16.mxu0 %v1493_v10 }
 0x320   :  { %2652 = vmatmul.mubr.bf16.gmra.mxu1 %v2739_v11 }
 0x321   :  { %2668 = vmatpush3.bf16.msra.mxu0 %v1493_v10  ;;  %2655 = vmatprep.mubr.bf16.mxu1 %v2741_v12 }
 0x322   :  { %2669 = vmatprep.subr.bf16.mxu0 %v1492_v13 }
 0x325   :  { %2670 = vmatpush3.bf16.msra.mxu0 %v1492_v13 }
 0x326   :  { %2671 = vmatprep.subr.bf16.mxu0 %v1491_v14 }
 0x328   :  { %2656 = vmatmul.mubr.bf16.gmra.mxu1 %v2743_v16 }
 0x329   :  { %2672 = vmatpush3.bf16.msra.mxu0 %v1491_v14 }
 0x32a   :  { %2673 = vmatprep.subr.bf16.mxu0 %v1490_v17 }
 0x32d   :  { %2674 = vmatpush3.bf16.msra.mxu0 %v1490_v17 }
 0x330   :  { %2676 = vmatmul.mubr.bf16.vlgmr.msra.gmra.mxu0 %v2732_v18 }
 0x331   :  { %2679 = vmatprep.mubr.bf16.mxu0 %v2734_v19 }
 0x338   :  { %2680 = vmatmul.mubr.bf16.gmra.mxu0 %v2736_v38 }
 0x339   :  { %2683 = vmatprep.mubr.bf16.mxu0 %v2738_v20 }
 0x340   :  { %2684 = vmatmul.mubr.bf16.gmra.mxu0 %v2740_v21 }
 0x341   :  { %2687 = vmatprep.mubr.bf16.mxu0 %v2742_v22 }
 0x348   :  { %2688 = vmatmul.mubr.bf16.gmra.mxu0 %v2744_v23 }
 0x3d0   :  { %v2645_v24 = vpop.f32.mrf.mxu1 }
 0x3d1   :  { %2087 = vst.msk [vmem:[%s3408_s8 + $0x90] sm:$0xff] %vm1872_vm3, %v2645_v24  ;;  %v1824_v43 = vmul.f32 %v2645_v24, %v3213_v39 }
 0x3d2   :  { %v1596_v25 = vpop.f32.mrf.mxu1 }
 0x3d3   :  { %2085 = vst.msk [vmem:[%s3408_s8 + $0x80] sm:$0xff] %vm1872_vm3, %v1596_v25  ;;  %v1822_v49 = vmul.f32 %v3213_v39, %v1596_v25 }
 0x3d4   :  { %v2646_v26 = vpop.f32.mrf.mxu1 }
 0x3d5   :  { %2088 = vst.msk [vmem:[%s3408_s8 + $0x98] sm:$0xff] %vm1872_vm3, %v2646_v26  ;;  %v1825_v53 = vmul.f32 %v2646_v26, %v3213_v39 }
 0x3d6   :  { %v1599_v27 = vpop.f32.mrf.mxu1 }
 0x3d7   :  { %2086 = vst.msk [vmem:[%s3408_s8 + $0x88] sm:$0xff] %vm1872_vm3, %v1599_v27  ;;  %v1823_v57 = vmul.f32 %v3213_v39, %v1599_v27 }
 0x3d8   :  { %v2649_v28 = vpop.f32.mrf.mxu1 }
 0x3d9   :  { %2091 = vst.msk [vmem:[%s3408_s8 + $0xb0] sm:$0xff] %vm1872_vm3, %v2649_v28  ;;  %v1828_v59 = vmul.f32 %v2649_v28, %v3213_v39 }
 0x3da   :  { %v1612_v29 = vpop.f32.mrf.mxu1 }
 0x3db   :  { %2089 = vst.msk [vmem:[%s3408_s8 + $0xa0] sm:$0xff] %vm1872_vm3, %v1612_v29  ;;  %v1826_v0 = vmul.f32 %v3213_v39, %v1612_v29 }
 0x3dc   :  { %v2650_v30 = vpop.f32.mrf.mxu1 }
 0x3dd   :  { %2092 = vst.msk [vmem:[%s3408_s8 + $0xb8] sm:$0xff] %vm1872_vm3, %v2650_v30  ;;  %v1829_v3 = vmul.f32 %v2650_v30, %v3213_v39 }
 0x3de   :  { %v3164_v31 = vpop.f32.mrf.mxu1 }
 0x3df   :  { %2090 = vst.msk [vmem:[%s3408_s8 + $0xa8] sm:$0xff] %vm1872_vm3, %v3164_v31  ;;  %v1827_v7 = vmul.f32 %v3213_v39, %v3164_v31 }
 0x3e0   :  { %v3171_v32 = vpop.f32.mrf.mxu1 }
 0x3e1   :  { %2095 = vst.msk [vmem:[%s3408_s8 + $0xd0] sm:$0xff] %vm1872_vm3, %v3171_v32  ;;  %v1832_v9 = vmul.f32 %v3171_v32, %v3213_v39 }
 0x3e2   :  { %v3178_v33 = vpop.f32.mrf.mxu1 }
 0x3e3   :  { %2093 = vst.msk [vmem:[%s3408_s8 + $0xc0] sm:$0xff] %vm1872_vm3, %v3178_v33  ;;  %v1830_v16 = vmul.f32 %v3213_v39, %v3178_v33 }
 0x3e4   :  { %v3185_v34 = vpop.f32.mrf.mxu1 }
 0x3e5   :  { %2096 = vst.msk [vmem:[%s3408_s8 + $0xd8] sm:$0xff] %vm1872_vm3, %v3185_v34  ;;  %v1833_v38 = vmul.f32 %v3185_v34, %v3213_v39 }
 0x3e6   :  { %v3192_v35 = vpop.f32.mrf.mxu1 }
 0x3e7   :  { %2094 = vst.msk [vmem:[%s3408_s8 + $0xc8] sm:$0xff] %vm1872_vm3, %v3192_v35  ;;  %v1831_v23 = vmul.f32 %v3213_v39, %v3192_v35 }
 0x3e8   :  { %v3199_v36 = vpop.f32.mrf.mxu1 }
 0x3e9   :  { %2099 = vst.msk [vmem:[%s3408_s8 + $0xf0] sm:$0xff] %vm1872_vm3, %v3199_v36  ;;  %v1836_v25 = vmul.f32 %v3199_v36, %v3213_v39 }
 0x3ea   :  { %v3206_v37 = vpop.f32.mrf.mxu1 }
 0x3eb   :  { %2097 = vst.msk [vmem:[%s3408_s8 + $0xe0] sm:$0xff] %vm1872_vm3, %v3206_v37  ;;  %v1834_v31 = vmul.f32 %v3213_v39, %v3206_v37 }
 0x3ec   :  { %v3215_v40 = vpop.f32.mrf.mxu1 }
 0x3ed   :  { %2100 = vst.msk [vmem:[%s3408_s8 + $0xf8] sm:$0xff] %vm1872_vm3, %v3215_v40  ;;  %v1837_v35 = vmul.f32 %v3215_v40, %v3213_v39 }
 0x3ee   :  { %v3224_v42 = vpop.f32.mrf.mxu1 }
 0x3ef   :  { %2098 = vst.msk [vmem:[%s3408_s8 + $0xe8] sm:$0xff] %vm1872_vm3, %v3224_v42 }
 0x3f0   :  { %v2677_v45 = vpop.f32.mrf.mxu0 }
 0x3f1   :  { %v1842_v46 = vmul.f32 %v2677_v45, %v3222_v41  ;;  %2103 = vst.msk [vmem:[%s3408_s8 + $0x110] sm:$0xff] %vm1872_vm3, %v2677_v45  ;;  %v1835_v45 = vmul.f32 %v3213_v39, %v3224_v42 }
 0x3f2   :  { %v1757_v47 = vpop.f32.mrf.mxu0 }
 0x3f3   :  { %v1858_v48 = vadd.f32 %v1842_v46, %v1824_v43  ;;  %v1840_v50 = vmul.f32 %v3222_v41, %v1757_v47  ;;  %2101 = vst.msk [vmem:[%s3408_s8 + $0x100] sm:$0xff] %vm1872_vm3, %v1757_v47 }
 0x3f4   :  { %v2678_v51 = vpop.f32.mrf.mxu0 }
 0x3f5   :  { %1875 = vst.msk [vmem:[%s3408_s8 + $0x10] sm:$0xff] %vm1872_vm3, %v1858_v48  ;;  %v1856_v52 = vadd.f32 %v1840_v50, %v1822_v49  ;;  %v1843_v54 = vmul.f32 %v2678_v51, %v3222_v41  ;;  %2104 = vst.msk [vmem:[%s3408_s8 + $0x118] sm:$0xff] %vm1872_vm3, %v2678_v51 }
 0x3f6   :  { %v1760_v55 = vpop.f32.mrf.mxu0 }
 0x3f7   :  { %1873 = vst.msk [vmem:[%s3408_s8] sm:$0xff] %vm1872_vm3, %v1856_v52  ;;  %v1859_v56 = vadd.f32 %v1843_v54, %v1825_v53  ;;  %v1841_v58 = vmul.f32 %v3222_v41, %v1760_v55  ;;  %2102 = vst.msk [vmem:[%s3408_s8 + $0x108] sm:$0xff] %vm1872_vm3, %v1760_v55 }
 0x3f8   :  { %v2681_v60 = vpop.f32.mrf.mxu0 }
 0x3f9   :  { %1876 = vst.msk [vmem:[%s3408_s8 + $0x18] sm:$0xff] %vm1872_vm3, %v1859_v56  ;;  %v1857_v61 = vadd.f32 %v1841_v58, %v1823_v57  ;;  %v1846_v62 = vmul.f32 %v2681_v60, %v3222_v41  ;;  %2107 = vst.msk [vmem:[%s3408_s8 + $0x130] sm:$0xff] %vm1872_vm3, %v2681_v60 }
 0x3fa   :  { %v1773_v63 = vpop.f32.mrf.mxu0 }
 0x3fb   :  { %1874 = vst.msk [vmem:[%s3408_s8 + $0x8] sm:$0xff] %vm1872_vm3, %v1857_v61  ;;  %v1862_v15 = vadd.f32 %v1846_v62, %v1828_v59  ;;  %v1844_v1 = vmul.f32 %v3222_v41, %v1773_v63  ;;  %2105 = vst.msk [vmem:[%s3408_s8 + $0x120] sm:$0xff] %vm1872_vm3, %v1773_v63 }
 0x3fc   :  { %v2682_v2 = vpop.f32.mrf.mxu0 }
 0x3fd   :  { %1879 = vst.msk [vmem:[%s3408_s8 + $0x30] sm:$0xff] %vm1872_vm3, %v1862_v15  ;;  %v1860_v44 = vadd.f32 %v1844_v1, %v1826_v0  ;;  %v1847_v4 = vmul.f32 %v2682_v2, %v3222_v41  ;;  %2108 = vst.msk [vmem:[%s3408_s8 + $0x138] sm:$0xff] %vm1872_vm3, %v2682_v2 }
 0x3fe   :  { %v1776_v5 = vpop.f32.mrf.mxu0 }
 0x3ff   :  { %1877 = vst.msk [vmem:[%s3408_s8 + $0x20] sm:$0xff] %vm1872_vm3, %v1860_v44  ;;  %v1863_v6 = vadd.f32 %v1847_v4, %v1829_v3  ;;  %v1845_v8 = vmul.f32 %v3222_v41, %v1776_v5  ;;  %2106 = vst.msk [vmem:[%s3408_s8 + $0x128] sm:$0xff] %vm1872_vm3, %v1776_v5 }
 0x400   :  { %v2685_v10 = vpop.f32.mrf.mxu0 }
 0x401   :  { %1880 = vst.msk [vmem:[%s3408_s8 + $0x38] sm:$0xff] %vm1872_vm3, %v1863_v6  ;;  %v1861_v11 = vadd.f32 %v1845_v8, %v1827_v7  ;;  %v1850_v12 = vmul.f32 %v2685_v10, %v3222_v41  ;;  %2111 = vst.msk [vmem:[%s3408_s8 + $0x150] sm:$0xff] %vm1872_vm3, %v2685_v10 }
 0x402   :  { %v1789_v13 = vpop.f32.mrf.mxu0 }
 0x403   :  { %1878 = vst.msk [vmem:[%s3408_s8 + $0x28] sm:$0xff] %vm1872_vm3, %v1861_v11  ;;  %v1866_v14 = vadd.f32 %v1850_v12, %v1832_v9  ;;  %v1848_v17 = vmul.f32 %v3222_v41, %v1789_v13  ;;  %2109 = vst.msk [vmem:[%s3408_s8 + $0x140] sm:$0xff] %vm1872_vm3, %v1789_v13 }
 0x404   :  { %v2686_v18 = vpop.f32.mrf.mxu0 }
 0x405   :  { %1883 = vst.msk [vmem:[%s3408_s8 + $0x50] sm:$0xff] %vm1872_vm3, %v1866_v14  ;;  %v1864_v19 = vadd.f32 %v1848_v17, %v1830_v16  ;;  %v1851_v20 = vmul.f32 %v2686_v18, %v3222_v41  ;;  %2112 = vst.msk [vmem:[%s3408_s8 + $0x158] sm:$0xff] %vm1872_vm3, %v2686_v18 }
 0x406   :  { %v1792_v21 = vpop.f32.mrf.mxu0 }
 0x407   :  { %1881 = vst.msk [vmem:[%s3408_s8 + $0x40] sm:$0xff] %vm1872_vm3, %v1864_v19  ;;  %v1867_v22 = vadd.f32 %v1851_v20, %v1833_v38  ;;  %v1849_v24 = vmul.f32 %v3222_v41, %v1792_v21  ;;  %2110 = vst.msk [vmem:[%s3408_s8 + $0x148] sm:$0xff] %vm1872_vm3, %v1792_v21 }
 0x408   :  { %v2689_v26 = vpop.f32.mrf.mxu0 }
 0x409   :  { %1884 = vst.msk [vmem:[%s3408_s8 + $0x58] sm:$0xff] %vm1872_vm3, %v1867_v22  ;;  %v1865_v27 = vadd.f32 %v1849_v24, %v1831_v23  ;;  %v1854_v28 = vmul.f32 %v2689_v26, %v3222_v41  ;;  %2115 = vst.msk [vmem:[%s3408_s8 + $0x170] sm:$0xff] %vm1872_vm3, %v2689_v26 }
 0x40a   :  { %v1805_v29 = vpop.f32.mrf.mxu0 }
 0x40b   :  { %1882 = vst.msk [vmem:[%s3408_s8 + $0x48] sm:$0xff] %vm1872_vm3, %v1865_v27  ;;  %v1870_v30 = vadd.f32 %v1854_v28, %v1836_v25  ;;  %v1852_v32 = vmul.f32 %v3222_v41, %v1805_v29  ;;  %2113 = vst.msk [vmem:[%s3408_s8 + $0x160] sm:$0xff] %vm1872_vm3, %v1805_v29 }
 0x40c   :  { %v2690_v33 = vpop.f32.mrf.mxu0 }
 0x40d   :  { %1887 = vst.msk [vmem:[%s3408_s8 + $0x70] sm:$0xff] %vm1872_vm3, %v1870_v30  ;;  %v1868_v34 = vadd.f32 %v1852_v32, %v1834_v31  ;;  %v1855_v36 = vmul.f32 %v2690_v33, %v3222_v41  ;;  %2116 = vst.msk [vmem:[%s3408_s8 + $0x178] sm:$0xff] %vm1872_vm3, %v2690_v33 }
 0x40e   :  { %v1808_v37 = vpop.f32.mrf.mxu0 }
 0x40f   :  { %1885 = vst.msk [vmem:[%s3408_s8 + $0x60] sm:$0xff] %vm1872_vm3, %v1868_v34  ;;  %v1871_v43 = vadd.f32 %v1855_v36, %v1837_v35  ;;  %v1853_v46 = vmul.f32 %v3222_v41, %v1808_v37  ;;  %2114 = vst.msk [vmem:[%s3408_s8 + $0x168] sm:$0xff] %vm1872_vm3, %v1808_v37 }
 0x411   :  { %1888 = vst.msk [vmem:[%s3408_s8 + $0x78] sm:$0xff] %vm1872_vm3, %v1871_v43  ;;  %v1869_v40 = vadd.f32 %v1853_v46, %v1835_v45 }
 0x413   :  { %1886 = vst.msk [vmem:[%s3408_s8 + $0x68] sm:$0xff] %vm1872_vm3, %v1869_v40 }
 0x414   :  { %1927 = vsyncpa [#allocation5], 1 }
 0x415   :  { %1928 = vsyncpa [#allocation6], 1 }
 0x416   :  { %1929 = vsyncpa [#allocation8], 1 }

</bundles_post_ra>
